<compile_context>
chip_gen: v7x
topology: tpu7x:2x2x1
jax: 0.10.0
libtpu: 0.0.40
codegen_flags: <defaults>
</compile_context>

<pallas_src>
import functools

import jax
import jax.numpy as jnp
from jax.experimental import pallas as pl
from jax.experimental.pallas import tpu as pltpu

LANES = 128
SUBLANES = 8


def _round_up(n, m):
    return (n + m - 1) // m * m


def deepq_kernel(x_ref, a_ref,
                 w1_ref, b1_ref, w2_ref, b2_ref, w3_ref, b3_ref,
                 q_ref, out_ref):
    """One batch tile of the fused MLP + masked row-sum.

    x:  (TB, 2048) f32     a:  (TB, A_PAD) f32 one-hot (zero-padded lanes)
    wK: (in, out)  bf16    bK: (1, out)    f32
    q:  (TB, A_PAD) f32    out:(TB, 1)     f32
    """
    x = x_ref[...]

    # bf16 weights are upcast to f32 for the dot: the HBM->VMEM DMA (the real
    # bottleneck here) is already halved; compute stays in f32 so the VPU work
    # is exact on v5e (no bf16 VPU) and matches the f32 reference.
    h1 = jnp.dot(x, w1_ref[...].astype(jnp.float32),
                 preferred_element_type=jnp.float32) + b1_ref[...]
    h1 = jnp.maximum(h1, 0.0)

    h2 = jnp.dot(h1, w2_ref[...].astype(jnp.float32),
                 preferred_element_type=jnp.float32) + b2_ref[...]
    h2 = jnp.maximum(h2, 0.0)

    q = jnp.dot(h2, w3_ref[...].astype(jnp.float32),
                preferred_element_type=jnp.float32) + b3_ref[...]
    q_ref[...] = q

    # Padded action lanes carry zero weights/bias and zero one-hot entries, so
    # the masked row-sum is unaffected by the lane padding.
    out_ref[...] = jnp.sum(a_ref[...] * q, axis=1, keepdims=True)


@functools.partial(jax.jit, static_argnames=("block_b",))
def deepq_forward(x, actions_one_hot, params, *, block_b=256):
    """Runs the full DeepQ forward in one Pallas call.

    Returns (out, q_outputs): out is (B, 1), q_outputs is (B, n_actions).
    `params` must come from `pack_params` (bf16 weights, lane-padded layer 3).
    """
    w1, b1, w2, b2, w3, b3 = params
    B, f_in = x.shape
    n_actions = actions_one_hot.shape[1]
    a_pad = w3.shape[1]          # lane-padded action width (multiple of 128)
    h1_d = w1.shape[1]
    h2_d = w2.shape[1]

    # Batch tile: multiple of 8 sublanes, capped at block_b (keeps VMEM/vreg
    # pressure bounded on all generations, incl. v5e's 16 MiB scoped default).
    tb = min(block_b, _round_up(B, SUBLANES))
    b_pad = _round_up(B, tb)
    grid = (b_pad // tb,)

    x_p = x if b_pad == B else jnp.pad(x, ((0, b_pad - B), (0, 0)))
    a_p = jnp.pad(actions_one_hot,
                  ((0, b_pad - B), (0, a_pad - n_actions)))

    flops = 2 * b_pad * (f_in * h1_d + h1_d * h2_d + h2_d * a_pad)
    bytes_accessed = (
        (w1.size + w2.size + w3.size) * 2          # bf16 weights
        + (b1.size + b2.size + b3.size) * 4        # f32 biases
        + x_p.size * 4 + a_p.size * 4              # activations in
        + b_pad * (a_pad + 1) * 4                  # q + out
    )

    tiled = lambda i: (i, 0)     # batch-tiled arrays
    const = lambda i: (0, 0)     # weights/biases stay resident across the grid

    q_pad, out_pad = pl.pallas_call(
        deepq_kernel,
        out_shape=(
            jax.ShapeDtypeStruct((b_pad, a_pad), jnp.float32),   # q_outputs
            jax.ShapeDtypeStruct((b_pad, 1), jnp.float32),       # sum Q(s, a)
        ),
        grid=grid,
        in_specs=[
            pl.BlockSpec((tb, f_in), tiled),       # x
            pl.BlockSpec((tb, a_pad), tiled),      # actions one-hot (padded)
            pl.BlockSpec((f_in, h1_d), const),     # w1 (bf16)
            pl.BlockSpec((1, h1_d), const),        # b1
            pl.BlockSpec((h1_d, h2_d), const),     # w2 (bf16)
            pl.BlockSpec((1, h2_d), const),        # b2
            pl.BlockSpec((h2_d, a_pad), const),    # w3 (bf16, lane-padded)
            pl.BlockSpec((1, a_pad), const),       # b3 (lane-padded)
        ],
        out_specs=(
            pl.BlockSpec((tb, a_pad), tiled),
            pl.BlockSpec((tb, 1), tiled),
        ),
        compiler_params=pltpu.CompilerParams(
            dimension_semantics=("parallel",),      # shards batch tiles on v7x
            vmem_limit_bytes=32 * 1024 * 1024,
        ),
        cost_estimate=pl.CostEstimate(
            flops=flops, transcendentals=0, bytes_accessed=bytes_accessed),
    )(x_p, a_p, w1, b1, w2, b2, w3, b3)

    return out_pad[:B], q_pad[:B, :n_actions]


def init_params(key, n_actions):
    """Deterministic f32 parameter init (PyTorch-Linear-style uniform bounds).

    Weights are stored as (in, out) = transpose of PyTorch's (out, in).
    """
    dims = [(2048, 512), (512, 128), (128, n_actions)]
    params = []
    for fan_in, fan_out in dims:
        key, kw, kb = jax.random.split(key, 3)
        bound = 1.0 / (fan_in ** 0.5)
        w = jax.random.uniform(kw, (fan_in, fan_out), jnp.float32, -bound, bound)
        b = jax.random.uniform(kb, (1, fan_out), jnp.float32, -bound, bound)
        params += [w, b]
    return tuple(params)


def pack_params(params, lane_pad=LANES):
    """Kernel-side params: bf16 weights (halves the weight HBM DMA), f32
    biases, last layer zero-padded to a lane-dense width (multiple of 128)."""
    # TODO(synk): optional int8 quantization of w1 for v5e/v6e (int MXU) and a
    # cross-pallas_call weight-residency (P10) path for tight tiny-batch loops.
    w1, b1, w2, b2, w3, b3 = params
    n_actions = w3.shape[1]
    a_pad = _round_up(n_actions, lane_pad)
    w3p = jnp.pad(w3, ((0, 0), (0, a_pad - n_actions)))
    b3p = jnp.pad(b3, ((0, 0), (0, a_pad - n_actions)))
    return (w1.astype(jnp.bfloat16), b1,
            w2.astype(jnp.bfloat16), b2,
            w3p.astype(jnp.bfloat16), b3p)


def reference_forward(x, actions_one_hot, packed_params, n_actions):
    """Plain-JAX reference using the same (bf16-rounded) weights."""
    w1, b1, w2, b2, w3, b3 = packed_params
    h1 = jnp.maximum(x @ w1.astype(jnp.float32) + b1, 0.0)
    h2 = jnp.maximum(h1 @ w2.astype(jnp.float32) + b2, 0.0)
    q = (h2 @ w3.astype(jnp.float32) + b3)[:, :n_actions]
    out = jnp.sum(actions_one_hot * q, axis=1, keepdims=True)
    return out, q


if __name__ == "__main__":
    key = jax.random.PRNGKey(0)
    batch = 2
    n_actions = 8

    k_param, k_x, k_a = jax.random.split(key, 3)
    params = pack_params(init_params(k_param, n_actions))

    x = jax.random.normal(k_x, (batch, 2048), jnp.float32)
    action_idx = jax.random.randint(k_a, (batch,), 0, n_actions)
    actions_one_hot = jax.nn.one_hot(action_idx, n_actions, dtype=jnp.float32)

    out, q_outputs = deepq_forward(x, actions_one_hot, params)
    out = jax.block_until_ready(out)
    q_outputs = jax.block_until_ready(q_outputs)

    ref_out, ref_q = reference_forward(x, actions_one_hot, params, n_actions)
    assert out.shape == (batch, 1)
    assert q_outputs.shape == (batch, n_actions)
    assert jnp.allclose(out, ref_out, atol=1e-4, rtol=1e-4)
    assert jnp.allclose(q_outputs, ref_q, atol=1e-4, rtol=1e-4)

    print("KERNEL_OK")
</pallas_src>

<mosaic_0001>
module attributes {stable_mosaic.version = 11 : i64} {
  func.func @deepq_kernel(%arg0: i32, %arg1: memref<8x2048xf32, #tpu.memory_space<vmem>>, %arg2: memref<8x128xf32, #tpu.memory_space<vmem>>, %arg3: memref<2048x512xbf16, #tpu.memory_space<vmem>>, %arg4: memref<1x512xf32, #tpu.memory_space<vmem>>, %arg5: memref<512x128xbf16, #tpu.memory_space<vmem>>, %arg6: memref<1x128xf32, #tpu.memory_space<vmem>>, %arg7: memref<128x128xbf16, #tpu.memory_space<vmem>>, %arg8: memref<1x128xf32, #tpu.memory_space<vmem>>, %arg9: memref<8x128xf32, #tpu.memory_space<vmem>>, %arg10: memref<8x1xf32, #tpu.memory_space<vmem>>) attributes {dimension_semantics = [#tpu.dimension_semantics<parallel>], iteration_bounds = array<i64: 1>, scalar_prefetch = 0 : i64, scratch_operands = 0 : i64, tpu.core_type = #tpu.core_type<tc>, window_params = [{transform_indices = @transform_0, window_bounds = array<i64: 8, 2048>}, {transform_indices = @transform_1, window_bounds = array<i64: 8, 128>}, {pipeline_mode = #tpu.pipeline_mode<synchronous>, transform_indices = @transform_2, window_bounds = array<i64: 2048, 512>}, {pipeline_mode = #tpu.pipeline_mode<synchronous>, transform_indices = @transform_3, window_bounds = array<i64: 1, 512>}, {pipeline_mode = #tpu.pipeline_mode<synchronous>, transform_indices = @transform_4, window_bounds = array<i64: 512, 128>}, {pipeline_mode = #tpu.pipeline_mode<synchronous>, transform_indices = @transform_5, window_bounds = array<i64: 1, 128>}, {pipeline_mode = #tpu.pipeline_mode<synchronous>, transform_indices = @transform_6, window_bounds = array<i64: 128, 128>}, {pipeline_mode = #tpu.pipeline_mode<synchronous>, transform_indices = @transform_7, window_bounds = array<i64: 1, 128>}, {transform_indices = @transform_8, window_bounds = array<i64: 8, 128>}, {transform_indices = @transform_9, window_bounds = array<i64: 8, 1>}]} {
    %c0 = arith.constant 0 : index
    %c0_0 = arith.constant 0 : index
    %0 = vector.load %arg1[%c0, %c0_0] : memref<8x2048xf32, #tpu.memory_space<vmem>>, vector<8x2048xf32>
    %c0_1 = arith.constant 0 : index
    %c0_2 = arith.constant 0 : index
    %1 = vector.load %arg3[%c0_1, %c0_2] : memref<2048x512xbf16, #tpu.memory_space<vmem>>, vector<2048x512xbf16>
    %2 = arith.extf %1 : vector<2048x512xbf16> to vector<2048x512xf32>
    %cst = arith.constant dense<0.000000e+00> : vector<8x512xf32>
    %3 = tpu.matmul %0, %2, %cst {dimension_numbers = #tpu.dot_dimension_numbers<[1], [0], [0], [1], [0, 0, 1, 1], [], []>} : vector<8x2048xf32>, vector<2048x512xf32>, vector<8x512xf32> -> vector<8x512xf32>
    %c0_3 = arith.constant 0 : index
    %c0_4 = arith.constant 0 : index
    %4 = vector.load %arg4[%c0_3, %c0_4] : memref<1x512xf32, #tpu.memory_space<vmem>>, vector<1x512xf32>
    %5 = vector.broadcast %4 : vector<1x512xf32> to vector<8x512xf32>
    %6 = arith.addf %3, %5 : vector<8x512xf32>
    %cst_5 = arith.constant 0.000000e+00 : f32
    %7 = vector.broadcast %cst_5 : f32 to vector<8x512xf32>
    %8 = arith.maximumf %6, %7 : vector<8x512xf32>
    %c0_6 = arith.constant 0 : index
    %c0_7 = arith.constant 0 : index
    %9 = vector.load %arg5[%c0_6, %c0_7] : memref<512x128xbf16, #tpu.memory_space<vmem>>, vector<512x128xbf16>
    %10 = arith.extf %9 : vector<512x128xbf16> to vector<512x128xf32>
    %cst_8 = arith.constant dense<0.000000e+00> : vector<8x128xf32>
    %11 = tpu.matmul %8, %10, %cst_8 {dimension_numbers = #tpu.dot_dimension_numbers<[1], [0], [0], [1], [0, 0, 1, 1], [], []>} : vector<8x512xf32>, vector<512x128xf32>, vector<8x128xf32> -> vector<8x128xf32>
    %c0_9 = arith.constant 0 : index
    %c0_10 = arith.constant 0 : index
    %12 = vector.load %arg6[%c0_9, %c0_10] : memref<1x128xf32, #tpu.memory_space<vmem>>, vector<1x128xf32>
    %13 = vector.broadcast %12 : vector<1x128xf32> to vector<8x128xf32>
    %14 = arith.addf %11, %13 : vector<8x128xf32>
    %cst_11 = arith.constant 0.000000e+00 : f32
    %15 = vector.broadcast %cst_11 : f32 to vector<8x128xf32>
    %16 = arith.maximumf %14, %15 : vector<8x128xf32>
    %c0_12 = arith.constant 0 : index
    %c0_13 = arith.constant 0 : index
    %17 = vector.load %arg7[%c0_12, %c0_13] : memref<128x128xbf16, #tpu.memory_space<vmem>>, vector<128x128xbf16>
    %18 = arith.extf %17 : vector<128x128xbf16> to vector<128x128xf32>
    %cst_14 = arith.constant dense<0.000000e+00> : vector<8x128xf32>
    %19 = tpu.matmul %16, %18, %cst_14 {dimension_numbers = #tpu.dot_dimension_numbers<[1], [0], [0], [1], [0, 0, 1, 1], [], []>} : vector<8x128xf32>, vector<128x128xf32>, vector<8x128xf32> -> vector<8x128xf32>
    %c0_15 = arith.constant 0 : index
    %c0_16 = arith.constant 0 : index
    %20 = vector.load %arg8[%c0_15, %c0_16] : memref<1x128xf32, #tpu.memory_space<vmem>>, vector<1x128xf32>
    %21 = vector.broadcast %20 : vector<1x128xf32> to vector<8x128xf32>
    %22 = arith.addf %19, %21 : vector<8x128xf32>
    %c0_17 = arith.constant 0 : index
    %c0_18 = arith.constant 0 : index
    %23 = vector.load %arg9[%c0_17, %c0_18] : memref<8x128xf32, #tpu.memory_space<vmem>>, vector<8x128xf32>
    tpu.vector_store %arg9[%c0_17, %c0_18], %22 {strides = array<i32>} : memref<8x128xf32, #tpu.memory_space<vmem>>, vector<8x128xf32>,
    %c0_19 = arith.constant 0 : index
    %c0_20 = arith.constant 0 : index
    %24 = vector.load %arg2[%c0_19, %c0_20] : memref<8x128xf32, #tpu.memory_space<vmem>>, vector<8x128xf32>
    %25 = arith.mulf %24, %22 : vector<8x128xf32>
    %cst_21 = arith.constant dense<0.000000e+00> : vector<8xf32>
    %26 = vector.multi_reduction <add>, %25, %cst_21 [1] : vector<8x128xf32> to vector<8xf32>
    %27 = vector.shape_cast %26 : vector<8xf32> to vector<8x1xf32>
    %c0_22 = arith.constant 0 : index
    %c0_23 = arith.constant 0 : index
    %28 = vector.load %arg10[%c0_22, %c0_23] : memref<8x1xf32, #tpu.memory_space<vmem>>, vector<8x1xf32>
    tpu.vector_store %arg10[%c0_22, %c0_23], %27 {strides = array<i32>} : memref<8x1xf32, #tpu.memory_space<vmem>>, vector<8x1xf32>,
    return
  }
  func.func @transform_0(%arg0: i32) -> (i32, i32) {
    %c0_i32 = arith.constant 0 : i32
    %c0_i32_0 = arith.constant 0 : i32
    return %arg0, %c0_i32 : i32, i32
  }
  func.func @transform_1(%arg0: i32) -> (i32, i32) {
    %c0_i32 = arith.constant 0 : i32
    %c0_i32_0 = arith.constant 0 : i32
    return %arg0, %c0_i32 : i32, i32
  }
  func.func @transform_2(%arg0: i32) -> (i32, i32) {
    %c0_i32 = arith.constant 0 : i32
    %c0_i32_0 = arith.constant 0 : i32
    %c0_i32_1 = arith.constant 0 : i32
    return %c0_i32, %c0_i32_0 : i32, i32
  }
  func.func @transform_3(%arg0: i32) -> (i32, i32) {
    %c0_i32 = arith.constant 0 : i32
    %c0_i32_0 = arith.constant 0 : i32
    %c0_i32_1 = arith.constant 0 : i32
    return %c0_i32, %c0_i32_0 : i32, i32
  }
  func.func @transform_4(%arg0: i32) -> (i32, i32) {
    %c0_i32 = arith.constant 0 : i32
    %c0_i32_0 = arith.constant 0 : i32
    %c0_i32_1 = arith.constant 0 : i32
    return %c0_i32, %c0_i32_0 : i32, i32
  }
  func.func @transform_5(%arg0: i32) -> (i32, i32) {
    %c0_i32 = arith.constant 0 : i32
    %c0_i32_0 = arith.constant 0 : i32
    %c0_i32_1 = arith.constant 0 : i32
    return %c0_i32, %c0_i32_0 : i32, i32
  }
  func.func @transform_6(%arg0: i32) -> (i32, i32) {
    %c0_i32 = arith.constant 0 : i32
    %c0_i32_0 = arith.constant 0 : i32
    %c0_i32_1 = arith.constant 0 : i32
    return %c0_i32, %c0_i32_0 : i32, i32
  }
  func.func @transform_7(%arg0: i32) -> (i32, i32) {
    %c0_i32 = arith.constant 0 : i32
    %c0_i32_0 = arith.constant 0 : i32
    %c0_i32_1 = arith.constant 0 : i32
    return %c0_i32, %c0_i32_0 : i32, i32
  }
  func.func @transform_8(%arg0: i32) -> (i32, i32) {
    %c0_i32 = arith.constant 0 : i32
    %c0_i32_0 = arith.constant 0 : i32
    return %arg0, %c0_i32 : i32, i32
  }
  func.func @transform_9(%arg0: i32) -> (i32, i32) {
    %c0_i32 = arith.constant 0 : i32
    %c0_i32_0 = arith.constant 0 : i32
    return %arg0, %c0_i32 : i32, i32
  }
}

</mosaic_0001>

<bundles_post_ra>
// kernel: deepq_forward.1
= control target key start
LH: loop header
LB: loop body
LE: loop exit
PB: predicated region body
PF: predicated region fallthrough
CT: control target
= control target key end

     0   :  { %15 = vsyncpa [#allocation3], 0  ;;  %s6316_s0 = inlined_call_operand.vmem [shape: f32[8,2048], index: 0, kind: input, shape index: {}]   ;;  %s6317_s1 = inlined_call_operand.vmem [shape: f32[8,128], index: 1, kind: input, shape index: {}]   ;;  %s6318_s2 = inlined_call_operand.hbm [shape: bf16[2048,512], index: 2, kind: input, shape index: {}]   ;;  %s6319_s3 = inlined_call_operand.hbm [shape: f32[1,512], index: 3, kind: input, shape index: {}]   ;;  %s6320_s4 = inlined_call_operand.hbm [shape: bf16[512,128], index: 4, kind: input, shape index: {}]   ;;  %s6321_s5 = inlined_call_operand.hbm [shape: f32[1,128], index: 5, kind: input, shape index: {}]   ;;  %s6322_s6 = inlined_call_operand.hbm [shape: bf16[128,128], index: 6, kind: input, shape index: {}]   ;;  %s6323_s7 = inlined_call_operand.hbm [shape: f32[1,128], index: 7, kind: input, shape index: {}]   ;;  %s6324_s8 = inlined_call_operand.vmem [shape: f32[8,128], index: 8, kind: output, shape index: {0}]   ;;  %s6325_s9 = inlined_call_operand.vmem [shape: f32[8,1], index: 9, kind: output, shape index: {1}]  }
   0x1   :  { %16 = vsyncpa [#allocation5], 0 }
   0x2   :  { %17 = vsyncpa [#allocation8], 0 }
   0x3   :  { %18 = vsyncpa [#allocation11], 0  ;;  %s6124_s30 = smov [#allocation4]   ;;  %s6125_s11 = smov [#allocation7]  }
   0x4   :  { %s41_s10 = sshll.u32 %s6124_s30, 4  ;;  %s63_s12 = sshll.u32 %s6125_s11, 4  ;;  %s42_s10 = int_to_ptr.vmem [resolvable:$true] %s41_s10  ;;  %s64_s12 = int_to_ptr.vmem [resolvable:$true] %s63_s12 }
   0x5   :  { %s5984_s15 = scalar_lea.hbm %s6319_s3, 64 }
   0x6   :  { %p5985_p0 = scmp.ne.s32.totalorder %s6319_s3, %s5984_s15  ;;  %p5988_p1 = scmp.lt.u32.totalorder %s5984_s15, %s6319_s3 }
   0x8   :  { %p5990_p2 = pnand %p5988_p1, %p5985_p0 }
   0xa   :  { %5993 = shalt.err (!%p5990_p2)
}
   0xb   :  { %s5994_s20 = scalar_lea.vmem %s42_s10, 64  ;;  %p5999_p4 = scmp.lt.s32.totalorder %s42_s10, %s42_s10 }
   0xc   :  { %p5995_p3 = scmp.ne.s32.totalorder %s42_s10, %s5994_s20  ;;  %p6000_p5 = scmp.lt.s32.totalorder %s5994_s20, %s5994_s20 }
   0xe   :  { %p6001_p6 = por %p6000_p5, %p5999_p4 }
  0x10   :  { %p6002_p7 = pnand %p6001_p6, %p5995_p3 }
  0x12   :  { %6005 = shalt.err (!%p6002_p7)
}
  0x13   :  { %44 = dma.hbm_to_vmem [thread:$0]  %s6319_s3, 64, %s42_s10, [#allocation5]  }
  0x14   :  { %s6006_s25 = scalar_lea.hbm %s6321_s5, 16 }
  0x15   :  { %p6007_p8 = scmp.ne.s32.totalorder %s6321_s5, %s6006_s25  ;;  %p6010_p9 = scmp.lt.u32.totalorder %s6006_s25, %s6321_s5 }
  0x17   :  { %p6012_p10 = pnand %p6010_p9, %p6007_p8 }
  0x19   :  { %6015 = shalt.err (!%p6012_p10)
}
  0x1a   :  { %s6016_s30 = scalar_lea.vmem %s64_s12, 16  ;;  %s6020_s11 = scalar_lea.vmem %s64_s12, 32 }
  0x1b   :  { %p6017_p11 = scmp.ne.s32.totalorder %s64_s12, %s6016_s30  ;;  %p6021_p12 = scmp.lt.s32.totalorder %s64_s12, %s64_s12 }
  0x1c   :  { %p6022_p13 = scmp.lt.s32.totalorder %s6020_s11, %s6016_s30 }
  0x1e   :  { %p6023_p0 = por %p6022_p13, %p6021_p12 }
  0x20   :  { %p6024_p1 = pnand %p6023_p0, %p6017_p11 }
  0x22   :  { %6027 = shalt.err (!%p6024_p1)
}
  0x23   :  { %66 = dma.hbm_to_vmem [thread:$0]  %s6321_s5, 16, %s64_s12, [#allocation8]  }
  0x24   :  { %s6126_s13 = smov [#allocation2]   ;;  %s6028_s17 = scalar_lea.hbm %s6318_s2, 65536 }
  0x25   :  { %s28_s14 = sshll.u32 %s6126_s13, 4  ;;  %p6029_p2 = scmp.ne.s32.totalorder %s6318_s2, %s6028_s17  ;;  %s29_s14 = int_to_ptr.vmem [resolvable:$true] %s28_s14 }
  0x26   :  { %p6032_p3 = scmp.lt.u32.totalorder %s6028_s17, %s6318_s2 }
  0x28   :  { %p6034_p4 = pnand %p6032_p3, %p6029_p2 }
  0x2a   :  { %6037 = shalt.err (!%p6034_p4)
}
  0x2b   :  { %s6038_s22 = scalar_lea.vmem %s29_s14, 65536  ;;  %p6043_p6 = scmp.lt.s32.totalorder %s29_s14, %s29_s14 }
  0x2c   :  { %p6039_p5 = scmp.ne.s32.totalorder %s29_s14, %s6038_s22  ;;  %p6044_p7 = scmp.lt.s32.totalorder %s6038_s22, %s6038_s22 }
  0x2e   :  { %p6045_p8 = por %p6044_p7, %p6043_p6 }
  0x30   :  { %p6046_p9 = pnand %p6045_p8, %p6039_p5 }
  0x32   :  { %6049 = shalt.err (!%p6046_p9)
}
  0x33   :  { %s6127_s5 = smov 256   ;;  %s6128_s12 = smov 16  }
  0x34   :  { %34 = dma.hbm_to_vmem [thread:$0]  %s6318_s2, 65536, %s29_s14, [#allocation3], %s6127_s5, %s6127_s5, %s6128_s12  }
  0x35   :  { %s6129_s25 = smov [#allocation6]   ;;  %s6050_s29 = scalar_lea.hbm %s6320_s4, 4096 }
  0x36   :  { %s50_s26 = sshll.u32 %s6129_s25, 4  ;;  %p6051_p10 = scmp.ne.s32.totalorder %s6320_s4, %s6050_s29  ;;  %s51_s26 = int_to_ptr.vmem [resolvable:$true] %s50_s26 }
  0x37   :  { %p6054_p11 = scmp.lt.u32.totalorder %s6050_s29, %s6320_s4 }
  0x39   :  { %p6056_p12 = pnand %p6054_p11, %p6051_p10 }
  0x3b   :  { %6059 = shalt.err (!%p6056_p12)
}
  0x3c   :  { %s6060_s13 = scalar_lea.vmem %s51_s26, 4096  ;;  %p6065_p0 = scmp.lt.s32.totalorder %s51_s26, %s51_s26 }
  0x3d   :  { %p6061_p13 = scmp.ne.s32.totalorder %s51_s26, %s6060_s13  ;;  %p6066_p1 = scmp.lt.s32.totalorder %s6060_s13, %s6060_s13 }
  0x3f   :  { %p6067_p2 = por %p6066_p1, %p6065_p0 }
  0x41   :  { %p6068_p3 = pnand %p6067_p2, %p6061_p13 }
  0x43   :  { %6071 = shalt.err (!%p6068_p3)
}
  0x44   :  { %s6130_s2 = smov 64   ;;  %s6131_s14 = smov 4  }
  0x45   :  { %56 = dma.hbm_to_vmem [thread:$0]  %s6320_s4, 4096, %s51_s26, [#allocation5], %s6130_s2, %s6130_s2, %s6131_s14  }
  0x46   :  { %s6132_s17 = smov [#allocation9]   ;;  %s6133_s19 = smov [#allocation10]  }
  0x47   :  { %s72_s18 = sshll.u32 %s6132_s17, 4  ;;  %s85_s20 = sshll.u32 %s6133_s19, 4  ;;  %s73_s18 = int_to_ptr.vmem [resolvable:$true] %s72_s18  ;;  %s86_s20 = int_to_ptr.vmem [resolvable:$true] %s85_s20 }
  0x48   :  { %s6072_s5 = scalar_lea.hbm %s6322_s6, 1024 }
  0x49   :  { %p6073_p4 = scmp.ne.s32.totalorder %s6322_s6, %s6072_s5  ;;  %p6076_p5 = scmp.lt.u32.totalorder %s6072_s5, %s6322_s6 }
  0x4b   :  { %p6078_p6 = pnand %p6076_p5, %p6073_p4 }
  0x4d   :  { %6081 = shalt.err (!%p6078_p6)
}
  0x4e   :  { %s6082_s4 = scalar_lea.vmem %s73_s18, 1024  ;;  %p6087_p8 = scmp.lt.s32.totalorder %s73_s18, %s73_s18 }
  0x4f   :  { %p6083_p7 = scmp.ne.s32.totalorder %s73_s18, %s6082_s4  ;;  %p6088_p9 = scmp.lt.s32.totalorder %s6082_s4, %s6082_s4 }
  0x51   :  { %p6089_p10 = por %p6088_p9, %p6087_p8 }
  0x53   :  { %p6090_p11 = pnand %p6089_p10, %p6083_p7 }
  0x55   :  { %6093 = shalt.err (!%p6090_p11)
}
  0x56   :  { %78 = dma.hbm_to_vmem [thread:$0]  %s6322_s6, 1024, %s73_s18, [#allocation8], %s6130_s2, %s6130_s2, %s6131_s14  }
  0x57   :  { %s6094_s30 = scalar_lea.hbm %s6323_s7, 16 }
  0x58   :  { %p6095_p12 = scmp.ne.s32.totalorder %s6323_s7, %s6094_s30  ;;  %p6098_p13 = scmp.lt.u32.totalorder %s6094_s30, %s6323_s7 }
  0x5a   :  { %p6100_p0 = pnand %p6098_p13, %p6095_p12 }
  0x5c   :  { %6103 = shalt.err (!%p6100_p0)
}
  0x5d   :  { %s6104_s15 = scalar_lea.vmem %s86_s20, 16  ;;  %s6108_s16 = scalar_lea.vmem %s86_s20, 32 }
  0x5e   :  { %p6105_p1 = scmp.ne.s32.totalorder %s86_s20, %s6104_s15  ;;  %p6109_p2 = scmp.lt.s32.totalorder %s86_s20, %s86_s20 }
  0x5f   :  { %p6110_p3 = scmp.lt.s32.totalorder %s6108_s16, %s6104_s15 }
  0x61   :  { %p6111_p4 = por %p6110_p3, %p6109_p2 }
  0x63   :  { %p6112_p5 = pnand %p6111_p4, %p6105_p1 }
  0x65   :  { %6115 = shalt.err (!%p6112_p5)
}
  0x66   :  { %88 = dma.hbm_to_vmem [thread:$0]  %s6323_s7, 16, %s86_s20, [#allocation11]  }
  0x67   :  { %6116 = dma.done.wait [#allocation3], 65536  }
  0x68   :  { %6117 = vsyncadd [#allocation3], 4294901760 }
  0x69   :  { %6118 = dma.done.wait [#allocation5], 4160  }
  0x6a   :  { %6119 = vsyncadd [#allocation5], 4294963136 }
  0x6b   :  { %6120 = dma.done.wait [#allocation8], 1040  }
  0x6c   :  { %6121 = vsyncadd [#allocation8], 4294966256 }
  0x6d   :  { %6122 = dma.done.wait [#allocation11], 16  }
  0x6e   :  { %6123 = vsyncadd [#allocation11], 4294967280  ;;  %v5216_v0 = vld [vmem:[#allocation2 + $0x4] ss:$16 sps:$4 sm:$0xff]   ;;  %v5218_v1 = vld [vmem:[#allocation2 + $0xc] ss:$16 sps:$4 sm:$0xff]  }
  0x6f   :  { %3548 = vmatprep.subr.bf16.mxu0 %v5216_v0  ;;  %v5220_v2 = vld [vmem:[#allocation2] ss:$16 sps:$4 sm:$0xff]   ;;  %v5221_v3 = vld [vmem:[#allocation2 + $0x8] ss:$16 sps:$4 sm:$0xff]   ;;  %4060 = vmatprep.subr.bf16.mxu1 %v5218_v1  ;;  %v5222_v4 = vld [vmem:[#allocation2 + $0x24] ss:$16 sps:$4 sm:$0xff]  }
  0x70   :  { %3550 = vmatpush1.bf16.msra.mxu0 %v5220_v2  ;;  %4062 = vmatpush1.bf16.msra.mxu1 %v5221_v3  ;;  %v5224_v5 = vld [vmem:[#allocation2 + $0x2c] ss:$16 sps:$4 sm:$0xff]   ;;  %v5226_v6 = vld [vmem:[#allocation2 + $0x20] ss:$16 sps:$4 sm:$0xff]   ;;  %v5227_v7 = vld [vmem:[#allocation2 + $0x28] ss:$16 sps:$4 sm:$0xff]  }
  0x71   :  { %3552 = vmatprep.subr.bf16.mxu0 %v5222_v4  ;;  %4064 = vmatprep.subr.bf16.mxu1 %v5224_v5  ;;  %v5228_v8 = vld [vmem:[#allocation2 + $0x44] ss:$16 sps:$4 sm:$0xff]   ;;  %v5230_v9 = vld [vmem:[#allocation2 + $0x4c] ss:$16 sps:$4 sm:$0xff]   ;;  %v5232_v10 = vld [vmem:[#allocation2 + $0x40] ss:$16 sps:$4 sm:$0xff]  }
  0x72   :  { %v5233_v11 = vld [vmem:[#allocation2 + $0x48] ss:$16 sps:$4 sm:$0xff]   ;;  %v5234_v12 = vld [vmem:[#allocation2 + $0x64] ss:$16 sps:$4 sm:$0xff]   ;;  %v5236_v13 = vld [vmem:[#allocation2 + $0x6c] ss:$16 sps:$4 sm:$0xff]  }
  0x73   :  { %v5238_v14 = vld [vmem:[#allocation2 + $0x60] ss:$16 sps:$4 sm:$0xff]   ;;  %v5239_v15 = vld [vmem:[#allocation2 + $0x68] ss:$16 sps:$4 sm:$0xff]   ;;  %v5240_v16 = vld [vmem:[#allocation2 + $0x84] ss:$16 sps:$4 sm:$0xff]  }
  0x74   :  { %3554 = vmatpush1.bf16.msra.mxu0 %v5226_v6  ;;  %4066 = vmatpush1.bf16.msra.mxu1 %v5227_v7  ;;  %v5242_v17 = vld [vmem:[#allocation2 + $0x8c] ss:$16 sps:$4 sm:$0xff]   ;;  %v5244_v18 = vld [vmem:[#allocation2 + $0x80] ss:$16 sps:$4 sm:$0xff]   ;;  %v5245_v19 = vld [vmem:[#allocation2 + $0x88] ss:$16 sps:$4 sm:$0xff]  }
  0x75   :  { %3556 = vmatprep.subr.bf16.mxu0 %v5228_v8  ;;  %4068 = vmatprep.subr.bf16.mxu1 %v5230_v9  ;;  %v5246_v20 = vld [vmem:[#allocation2 + $0xa4] ss:$16 sps:$4 sm:$0xff]   ;;  %v5248_v21 = vld [vmem:[#allocation2 + $0xac] ss:$16 sps:$4 sm:$0xff]   ;;  %v5250_v22 = vld [vmem:[#allocation2 + $0xa0] ss:$16 sps:$4 sm:$0xff]  }
  0x76   :  { %v5251_v23 = vld [vmem:[#allocation2 + $0xa8] ss:$16 sps:$4 sm:$0xff]   ;;  %v5252_v24 = vld [vmem:[#allocation2 + $0xc4] ss:$16 sps:$4 sm:$0xff]   ;;  %v5254_v25 = vld [vmem:[#allocation2 + $0xcc] ss:$16 sps:$4 sm:$0xff]  }
  0x77   :  { %v5256_v26 = vld [vmem:[#allocation2 + $0xc0] ss:$16 sps:$4 sm:$0xff]   ;;  %v5257_v27 = vld [vmem:[#allocation2 + $0xc8] ss:$16 sps:$4 sm:$0xff]   ;;  %v5258_v28 = vld [vmem:[#allocation2 + $0xe4] ss:$16 sps:$4 sm:$0xff]  }
  0x78   :  { %3558 = vmatpush1.bf16.msra.mxu0 %v5232_v10  ;;  %4070 = vmatpush1.bf16.msra.mxu1 %v5233_v11  ;;  %v5260_v29 = vld [vmem:[#allocation2 + $0xec] ss:$16 sps:$4 sm:$0xff]   ;;  %v5262_v30 = vld [vmem:[#allocation2 + $0xe0] ss:$16 sps:$4 sm:$0xff]   ;;  %v5263_v31 = vld [vmem:[#allocation2 + $0xe8] ss:$16 sps:$4 sm:$0xff]  }
  0x79   :  { %3560 = vmatprep.subr.bf16.mxu0 %v5234_v12  ;;  %4072 = vmatprep.subr.bf16.mxu1 %v5236_v13  ;;  %v5264_v32 = vld [vmem:[#allocation2 + $0x104] ss:$16 sps:$4 sm:$0xff]   ;;  %v5266_v33 = vld [vmem:[#allocation2 + $0x10c] ss:$16 sps:$4 sm:$0xff]   ;;  %v5268_v34 = vld [vmem:[#allocation2 + $0x100] ss:$16 sps:$4 sm:$0xff]  }
  0x7a   :  { %v5269_v35 = vld [vmem:[#allocation2 + $0x108] ss:$16 sps:$4 sm:$0xff]   ;;  %v5270_v36 = vld [vmem:[#allocation2 + $0x124] ss:$16 sps:$4 sm:$0xff]   ;;  %v5272_v37 = vld [vmem:[#allocation2 + $0x12c] ss:$16 sps:$4 sm:$0xff]  }
  0x7b   :  { %v5274_v38 = vld [vmem:[#allocation2 + $0x120] ss:$16 sps:$4 sm:$0xff]   ;;  %v5275_v39 = vld [vmem:[#allocation2 + $0x128] ss:$16 sps:$4 sm:$0xff]   ;;  %v5276_v40 = vld [vmem:[#allocation2 + $0x144] ss:$16 sps:$4 sm:$0xff]  }
  0x7c   :  { %3562 = vmatpush1.bf16.msra.mxu0 %v5238_v14  ;;  %4074 = vmatpush1.bf16.msra.mxu1 %v5239_v15  ;;  %v5278_v41 = vld [vmem:[#allocation2 + $0x14c] ss:$16 sps:$4 sm:$0xff]   ;;  %v5280_v42 = vld [vmem:[#allocation2 + $0x140] ss:$16 sps:$4 sm:$0xff]   ;;  %v5281_v43 = vld [vmem:[#allocation2 + $0x148] ss:$16 sps:$4 sm:$0xff]  }
  0x7d   :  { %3564 = vmatprep.subr.bf16.mxu0 %v5240_v16  ;;  %4076 = vmatprep.subr.bf16.mxu1 %v5242_v17  ;;  %v5282_v44 = vld [vmem:[#allocation2 + $0x164] ss:$16 sps:$4 sm:$0xff]   ;;  %v5284_v45 = vld [vmem:[#allocation2 + $0x16c] ss:$16 sps:$4 sm:$0xff]   ;;  %v5286_v47 = vld [vmem:[#allocation2 + $0x160] ss:$16 sps:$4 sm:$0xff]  }
  0x7e   :  { %v108_v46 = vld [vmem:[%s6316_s0 + $0x8] sm:$0xff]  ;;  %v5288_v49 = vld [vmem:[#allocation2 + $0x184] ss:$16 sps:$4 sm:$0xff]   ;;  %v5292_v51 = vld [vmem:[#allocation2 + $0x180] ss:$16 sps:$4 sm:$0xff]   ;;  %vm6135_vm0 = vmmov 0  }
  0x7f   :  { %1745 = vmatprep.mubr.f32.mxu0 %v108_v46  ;;  %2313 = vmatprep.mubr.f32.mxu1 %v108_v46  ;;  %v5287_v48 = vld [vmem:[#allocation2 + $0x168] ss:$16 sps:$4 sm:$0xff]   ;;  %v5290_v50 = vld [vmem:[#allocation2 + $0x18c] ss:$16 sps:$4 sm:$0xff]   ;;  %v5294_v53 = vld [vmem:[#allocation2 + $0x1a4] ss:$16 sps:$4 sm:$0xff]  }
  0x80   :  { %3566 = vmatpush1.bf16.msra.mxu0 %v5244_v18  ;;  %4078 = vmatpush1.bf16.msra.mxu1 %v5245_v19  ;;  %v5293_v52 = vld [vmem:[#allocation2 + $0x188] ss:$16 sps:$4 sm:$0xff]   ;;  %v5296_v54 = vld [vmem:[#allocation2 + $0x1ac] ss:$16 sps:$4 sm:$0xff]   ;;  %v5298_v55 = vld [vmem:[#allocation2 + $0x1a0] ss:$16 sps:$4 sm:$0xff]  }
  0x81   :  { %3568 = vmatprep.subr.bf16.mxu0 %v5246_v20  ;;  %4080 = vmatprep.subr.bf16.mxu1 %v5248_v21  ;;  %v5299_v56 = vld [vmem:[#allocation2 + $0x1a8] ss:$16 sps:$4 sm:$0xff]   ;;  %v5300_v57 = vld [vmem:[#allocation2 + $0x1c4] ss:$16 sps:$4 sm:$0xff]   ;;  %v5302_v58 = vld [vmem:[#allocation2 + $0x1cc] ss:$16 sps:$4 sm:$0xff]  }
  0x82   :  { %v5304_v59 = vld [vmem:[#allocation2 + $0x1c0] ss:$16 sps:$4 sm:$0xff]   ;;  %v5305_v60 = vld [vmem:[#allocation2 + $0x1c8] ss:$16 sps:$4 sm:$0xff]   ;;  %v5306_v61 = vld [vmem:[#allocation2 + $0x1e4] ss:$16 sps:$4 sm:$0xff]  }
  0x83   :  { %v5308_v62 = vld [vmem:[#allocation2 + $0x1ec] ss:$16 sps:$4 sm:$0xff]   ;;  %v5310_v63 = vld [vmem:[#allocation2 + $0x1e0] ss:$16 sps:$4 sm:$0xff]   ;;  %v5311_v0 = vld [vmem:[#allocation2 + $0x1e8] ss:$16 sps:$4 sm:$0xff]  }
  0x84   :  { %3570 = vmatpush1.bf16.msra.mxu0 %v5250_v22  ;;  %4082 = vmatpush1.bf16.msra.mxu1 %v5251_v23  ;;  %v5312_v1 = vld [vmem:[#allocation2 + $0x204] ss:$16 sps:$4 sm:$0xff]   ;;  %v5315_v2 = vld [vmem:[#allocation2 + $0x20c] ss:$16 sps:$4 sm:$0xff]   ;;  %v5314_v3 = vld [vmem:[#allocation2 + $0x200] ss:$16 sps:$4 sm:$0xff]  }
  0x85   :  { %3572 = vmatprep.subr.bf16.mxu0 %v5252_v24  ;;  %4084 = vmatprep.subr.bf16.mxu1 %v5254_v25  ;;  %v5317_v4 = vld [vmem:[#allocation2 + $0x208] ss:$16 sps:$4 sm:$0xff]   ;;  %v107_v5 = vld [vmem:[%s6316_s0] sm:$0xff]  ;;  %v5321_v7 = vld [vmem:[#allocation2 + $0x22c] ss:$16 sps:$4 sm:$0xff]   ;;  %vm3211_vm1 = vcmask 7168  }
  0x86   :  { %v5318_v6 = vld [vmem:[#allocation2 + $0x224] ss:$16 sps:$4 sm:$0xff]   ;;  %v5320_v8 = vld [vmem:[#allocation2 + $0x220] ss:$16 sps:$4 sm:$0xff]   ;;  %v5323_v9 = vld [vmem:[#allocation2 + $0x228] ss:$16 sps:$4 sm:$0xff]  }
  0x87   :  { %v5324_v10 = vld [vmem:[#allocation2 + $0x244] ss:$16 sps:$4 sm:$0xff]   ;;  %v5327_v11 = vld [vmem:[#allocation2 + $0x24c] ss:$16 sps:$4 sm:$0xff]   ;;  %v5326_v12 = vld [vmem:[#allocation2 + $0x240] ss:$16 sps:$4 sm:$0xff]  }
  0x88   :  { %3574 = vmatpush1.bf16.msra.mxu0 %v5256_v26  ;;  %4086 = vmatpush1.bf16.msra.mxu1 %v5257_v27  ;;  %v5329_v13 = vld [vmem:[#allocation2 + $0x248] ss:$16 sps:$4 sm:$0xff]   ;;  %v5330_v14 = vld [vmem:[#allocation2 + $0x264] ss:$16 sps:$4 sm:$0xff]   ;;  %v5333_v15 = vld [vmem:[#allocation2 + $0x26c] ss:$16 sps:$4 sm:$0xff]  }
  0x89   :  { %3576 = vmatprep.subr.bf16.mxu0 %v5258_v28  ;;  %4088 = vmatprep.subr.bf16.mxu1 %v5260_v29  ;;  %v5332_v16 = vld [vmem:[#allocation2 + $0x260] ss:$16 sps:$4 sm:$0xff]   ;;  %v5335_v17 = vld [vmem:[#allocation2 + $0x268] ss:$16 sps:$4 sm:$0xff]   ;;  %v5336_v18 = vld [vmem:[#allocation2 + $0x284] ss:$16 sps:$4 sm:$0xff]  }
  0x8a   :  { %v5339_v19 = vld [vmem:[#allocation2 + $0x28c] ss:$16 sps:$4 sm:$0xff]   ;;  %v5338_v20 = vld [vmem:[#allocation2 + $0x280] ss:$16 sps:$4 sm:$0xff]   ;;  %v5341_v21 = vld [vmem:[#allocation2 + $0x288] ss:$16 sps:$4 sm:$0xff]  }
  0x8b   :  { %v5342_v22 = vld [vmem:[#allocation2 + $0x2a4] ss:$16 sps:$4 sm:$0xff]   ;;  %v5345_v23 = vld [vmem:[#allocation2 + $0x2ac] ss:$16 sps:$4 sm:$0xff]   ;;  %v5344_v24 = vld [vmem:[#allocation2 + $0x2a0] ss:$16 sps:$4 sm:$0xff]  }
  0x8c   :  { %3578 = vmatpush1.bf16.msra.mxu0 %v5262_v30  ;;  %4090 = vmatpush1.bf16.msra.mxu1 %v5263_v31  ;;  %v5347_v25 = vld [vmem:[#allocation2 + $0x2a8] ss:$16 sps:$4 sm:$0xff]   ;;  %v5348_v26 = vld [vmem:[#allocation2 + $0x2c4] ss:$16 sps:$4 sm:$0xff]   ;;  %v5351_v27 = vld [vmem:[#allocation2 + $0x2cc] ss:$16 sps:$4 sm:$0xff]  }
  0x8d   :  { %3580 = vmatprep.subr.bf16.mxu0 %v5264_v32  ;;  %4092 = vmatprep.subr.bf16.mxu1 %v5266_v33  ;;  %v110_v28 = vld [vmem:[%s6316_s0 + $0x18] sm:$0xff]  ;;  %v5350_v29 = vld [vmem:[#allocation2 + $0x2c0] ss:$16 sps:$4 sm:$0xff]   ;;  %v5354_v31 = vld [vmem:[#allocation2 + $0x2e4] ss:$16 sps:$4 sm:$0xff]  }
  0x8e   :  { %v5353_v30 = vld [vmem:[#allocation2 + $0x2c8] ss:$16 sps:$4 sm:$0xff]   ;;  %v5357_v32 = vld [vmem:[#allocation2 + $0x2ec] ss:$16 sps:$4 sm:$0xff]   ;;  %v5356_v33 = vld [vmem:[#allocation2 + $0x2e0] ss:$16 sps:$4 sm:$0xff]  }
  0x8f   :  { %v5377_v46 = vld [vmem:[#allocation2 + $0x348] ss:$16 sps:$4 sm:$0xff]  }
  0x90   :  { %3582 = vmatpush1.bf16.msra.mxu0 %v5268_v34  ;;  %4094 = vmatpush1.bf16.msra.mxu1 %v5269_v35  ;;  %v5359_v34 = vld [vmem:[#allocation2 + $0x2e8] ss:$16 sps:$4 sm:$0xff]   ;;  %v5360_v35 = vld [vmem:[#allocation2 + $0x304] ss:$16 sps:$4 sm:$0xff]  }
  0x91   :  { %3584 = vmatprep.subr.bf16.mxu0 %v5270_v36  ;;  %4096 = vmatprep.subr.bf16.mxu1 %v5272_v37  ;;  %v5363_v36 = vld [vmem:[#allocation2 + $0x30c] ss:$16 sps:$4 sm:$0xff]   ;;  %v5362_v37 = vld [vmem:[#allocation2 + $0x300] ss:$16 sps:$4 sm:$0xff]  }
  0x94   :  { %3586 = vmatpush1.bf16.msra.mxu0 %v5274_v38  ;;  %4098 = vmatpush1.bf16.msra.mxu1 %v5275_v39  ;;  %v5365_v38 = vld [vmem:[#allocation2 + $0x308] ss:$16 sps:$4 sm:$0xff]   ;;  %v5366_v39 = vld [vmem:[#allocation2 + $0x324] ss:$16 sps:$4 sm:$0xff]  }
  0x95   :  { %3588 = vmatprep.subr.bf16.mxu0 %v5276_v40  ;;  %4100 = vmatprep.subr.bf16.mxu1 %v5278_v41  ;;  %v5369_v40 = vld [vmem:[#allocation2 + $0x32c] ss:$16 sps:$4 sm:$0xff]   ;;  %v5368_v41 = vld [vmem:[#allocation2 + $0x320] ss:$16 sps:$4 sm:$0xff]  }
  0x98   :  { %3590 = vmatpush1.bf16.msra.mxu0 %v5280_v42  ;;  %4102 = vmatpush1.bf16.msra.mxu1 %v5281_v43  ;;  %v5371_v42 = vld [vmem:[#allocation2 + $0x328] ss:$16 sps:$4 sm:$0xff]   ;;  %v5372_v43 = vld [vmem:[#allocation2 + $0x344] ss:$16 sps:$4 sm:$0xff]  }
  0x99   :  { %3592 = vmatprep.subr.bf16.mxu0 %v5282_v44  ;;  %4104 = vmatprep.subr.bf16.mxu1 %v5284_v45  ;;  %v5375_v44 = vld [vmem:[#allocation2 + $0x34c] ss:$16 sps:$4 sm:$0xff]   ;;  %v5374_v45 = vld [vmem:[#allocation2 + $0x340] ss:$16 sps:$4 sm:$0xff]  }
  0x9c   :  { %3594 = vmatpush1.bf16.msra.mxu0 %v5286_v47  ;;  %4106 = vmatpush1.bf16.msra.mxu1 %v5287_v48  ;;  %v5378_v47 = vld [vmem:[#allocation2 + $0x364] ss:$16 sps:$4 sm:$0xff]   ;;  %v5381_v48 = vld [vmem:[#allocation2 + $0x36c] ss:$16 sps:$4 sm:$0xff]  }
  0x9d   :  { %3596 = vmatprep.subr.bf16.mxu0 %v5288_v49  ;;  %4108 = vmatprep.subr.bf16.mxu1 %v5290_v50  ;;  %v5380_v49 = vld [vmem:[#allocation2 + $0x360] ss:$16 sps:$4 sm:$0xff]   ;;  %v5383_v50 = vld [vmem:[#allocation2 + $0x368] ss:$16 sps:$4 sm:$0xff]  }
  0xa0   :  { %3598 = vmatpush1.bf16.msra.mxu0 %v5292_v51  ;;  %4110 = vmatpush1.bf16.msra.mxu1 %v5293_v52  ;;  %v5384_v51 = vld [vmem:[#allocation2 + $0x384] ss:$16 sps:$4 sm:$0xff]   ;;  %v5387_v52 = vld [vmem:[#allocation2 + $0x38c] ss:$16 sps:$4 sm:$0xff]  }
  0xa1   :  { %3600 = vmatprep.subr.bf16.mxu0 %v5294_v53  ;;  %4112 = vmatprep.subr.bf16.mxu1 %v5296_v54  ;;  %v5386_v53 = vld [vmem:[#allocation2 + $0x380] ss:$16 sps:$4 sm:$0xff]   ;;  %v5389_v54 = vld [vmem:[#allocation2 + $0x388] ss:$16 sps:$4 sm:$0xff]  }
  0xa4   :  { %3602 = vmatpush1.bf16.msra.mxu0 %v5298_v55  ;;  %4114 = vmatpush1.bf16.msra.mxu1 %v5299_v56  ;;  %v5390_v55 = vld [vmem:[#allocation2 + $0x3a4] ss:$16 sps:$4 sm:$0xff]   ;;  %v5393_v56 = vld [vmem:[#allocation2 + $0x3ac] ss:$16 sps:$4 sm:$0xff]  }
  0xa5   :  { %3604 = vmatprep.subr.bf16.mxu0 %v5300_v57  ;;  %4116 = vmatprep.subr.bf16.mxu1 %v5302_v58  ;;  %v5392_v57 = vld [vmem:[#allocation2 + $0x3a0] ss:$16 sps:$4 sm:$0xff]   ;;  %v5395_v58 = vld [vmem:[#allocation2 + $0x3a8] ss:$16 sps:$4 sm:$0xff]  }
  0xa8   :  { %3606 = vmatpush1.bf16.msra.mxu0 %v5304_v59  ;;  %4118 = vmatpush1.bf16.msra.mxu1 %v5305_v60  ;;  %v5396_v59 = vld [vmem:[#allocation2 + $0x3c4] ss:$16 sps:$4 sm:$0xff]   ;;  %v5399_v60 = vld [vmem:[#allocation2 + $0x3cc] ss:$16 sps:$4 sm:$0xff]  }
  0xa9   :  { %3608 = vmatprep.subr.bf16.mxu0 %v5306_v61  ;;  %4120 = vmatprep.subr.bf16.mxu1 %v5308_v62  ;;  %v5398_v61 = vld [vmem:[#allocation2 + $0x3c0] ss:$16 sps:$4 sm:$0xff]   ;;  %v5401_v62 = vld [vmem:[#allocation2 + $0x3c8] ss:$16 sps:$4 sm:$0xff]  }
  0xac   :  { %3610 = vmatpush1.bf16.msra.mxu0 %v5310_v63  ;;  %4122 = vmatpush1.bf16.msra.mxu1 %v5311_v0  ;;  %v5402_v63 = vld [vmem:[#allocation2 + $0x3e4] ss:$16 sps:$4 sm:$0xff]   ;;  %v5405_v0 = vld [vmem:[#allocation2 + $0x3ec] ss:$16 sps:$4 sm:$0xff]  }
  0xad   :  { %3612 = vmatprep.subr.bf16.mxu0 %v5312_v1  ;;  %4124 = vmatprep.subr.bf16.mxu1 %v5315_v2  ;;  %v5404_v1 = vld [vmem:[#allocation2 + $0x3e0] ss:$16 sps:$4 sm:$0xff]   ;;  %v5407_v2 = vld [vmem:[#allocation2 + $0x3e8] ss:$16 sps:$4 sm:$0xff]  }
  0xaf   :  { %1746 = vmatmul.mubr.f32.vlgmr.msra.gmra.mrb[0].mxu0 %v107_v5  ;;  %2314 = vmatmul.mubr.f32.vlgmr.msra.gmra.mrb[0].mxu1 %v107_v5  ;;  %v5410_v5 = vld [vmem:[#allocation2 + $0x400] ss:$16 sps:$4 sm:$0xff]  }
  0xb0   :  { %3614 = vmatpush1.bf16.msra.mxu0 %v5314_v3  ;;  %4126 = vmatpush1.bf16.msra.mxu1 %v5317_v4  ;;  %v5408_v3 = vld [vmem:[#allocation2 + $0x404] ss:$16 sps:$4 sm:$0xff]   ;;  %v5411_v4 = vld [vmem:[#allocation2 + $0x40c] ss:$16 sps:$4 sm:$0xff]  }
  0xb1   :  { %3616 = vmatprep.subr.bf16.mxu0 %v5318_v6  ;;  %4128 = vmatprep.subr.bf16.mxu1 %v5321_v7  ;;  %v5413_v6 = vld [vmem:[#allocation2 + $0x408] ss:$16 sps:$4 sm:$0xff]   ;;  %v109_v7 = vld [vmem:[%s6316_s0 + $0x10] sm:$0xff] }
  0xb2   :  { %1816 = vmatprep.mubr.f32.mxu0 %v110_v28  ;;  %2384 = vmatprep.mubr.f32.mxu1 %v110_v28  ;;  %v5443_v28 = vld [vmem:[#allocation2 + $0x4a8] ss:$16 sps:$4 sm:$0xff]  }
  0xb4   :  { %3618 = vmatpush1.bf16.msra.mxu0 %v5320_v8  ;;  %4130 = vmatpush1.bf16.msra.mxu1 %v5323_v9  ;;  %v5414_v8 = vld [vmem:[#allocation2 + $0x424] ss:$16 sps:$4 sm:$0xff]   ;;  %v5417_v9 = vld [vmem:[#allocation2 + $0x42c] ss:$16 sps:$4 sm:$0xff]  }
  0xb5   :  { %3620 = vmatprep.subr.bf16.mxu0 %v5324_v10  ;;  %4132 = vmatprep.subr.bf16.mxu1 %v5327_v11  ;;  %v112_v10 = vld [vmem:[%s6316_s0 + $0x28] sm:$0xff]  ;;  %v5416_v11 = vld [vmem:[#allocation2 + $0x420] ss:$16 sps:$4 sm:$0xff]  }
  0xb8   :  { %3622 = vmatpush1.bf16.msra.mxu0 %v5326_v12  ;;  %4134 = vmatpush1.bf16.msra.mxu1 %v5329_v13  ;;  %v5419_v12 = vld [vmem:[#allocation2 + $0x428] ss:$16 sps:$4 sm:$0xff]   ;;  %v5420_v13 = vld [vmem:[#allocation2 + $0x444] ss:$16 sps:$4 sm:$0xff]  }
  0xb9   :  { %3624 = vmatprep.subr.bf16.mxu0 %v5330_v14  ;;  %4136 = vmatprep.subr.bf16.mxu1 %v5333_v15  ;;  %v5423_v14 = vld [vmem:[#allocation2 + $0x44c] ss:$16 sps:$4 sm:$0xff]   ;;  %v5422_v15 = vld [vmem:[#allocation2 + $0x440] ss:$16 sps:$4 sm:$0xff]  }
  0xbc   :  { %3626 = vmatpush1.bf16.msra.mxu0 %v5332_v16  ;;  %4138 = vmatpush1.bf16.msra.mxu1 %v5335_v17  ;;  %v5425_v16 = vld [vmem:[#allocation2 + $0x448] ss:$16 sps:$4 sm:$0xff]   ;;  %v5426_v17 = vld [vmem:[#allocation2 + $0x464] ss:$16 sps:$4 sm:$0xff]  }
  0xbd   :  { %3628 = vmatprep.subr.bf16.mxu0 %v5336_v18  ;;  %4140 = vmatprep.subr.bf16.mxu1 %v5339_v19  ;;  %v5429_v18 = vld [vmem:[#allocation2 + $0x46c] ss:$16 sps:$4 sm:$0xff]   ;;  %v5428_v19 = vld [vmem:[#allocation2 + $0x460] ss:$16 sps:$4 sm:$0xff]  }
  0xc0   :  { %3630 = vmatpush1.bf16.msra.mxu0 %v5338_v20  ;;  %4142 = vmatpush1.bf16.msra.mxu1 %v5341_v21  ;;  %v5431_v20 = vld [vmem:[#allocation2 + $0x468] ss:$16 sps:$4 sm:$0xff]   ;;  %v5432_v21 = vld [vmem:[#allocation2 + $0x484] ss:$16 sps:$4 sm:$0xff]  }
  0xc1   :  { %3632 = vmatprep.subr.bf16.mxu0 %v5342_v22  ;;  %4144 = vmatprep.subr.bf16.mxu1 %v5345_v23  ;;  %v5435_v22 = vld [vmem:[#allocation2 + $0x48c] ss:$16 sps:$4 sm:$0xff]   ;;  %v5434_v23 = vld [vmem:[#allocation2 + $0x480] ss:$16 sps:$4 sm:$0xff]  }
  0xc4   :  { %3634 = vmatpush1.bf16.msra.mxu0 %v5344_v24  ;;  %4146 = vmatpush1.bf16.msra.mxu1 %v5347_v25  ;;  %v5437_v24 = vld [vmem:[#allocation2 + $0x488] ss:$16 sps:$4 sm:$0xff]   ;;  %v5438_v25 = vld [vmem:[#allocation2 + $0x4a4] ss:$16 sps:$4 sm:$0xff]  }
  0xc5   :  { %3636 = vmatprep.subr.bf16.mxu0 %v5348_v26  ;;  %4148 = vmatprep.subr.bf16.mxu1 %v5351_v27  ;;  %v5441_v26 = vld [vmem:[#allocation2 + $0x4ac] ss:$16 sps:$4 sm:$0xff]   ;;  %v5440_v27 = vld [vmem:[#allocation2 + $0x4a0] ss:$16 sps:$4 sm:$0xff]  }
  0xc8   :  { %3638 = vmatpush1.bf16.msra.mxu0 %v5350_v29  ;;  %4150 = vmatpush1.bf16.msra.mxu1 %v5353_v30  ;;  %v5444_v29 = vld [vmem:[#allocation2 + $0x4c4] ss:$16 sps:$4 sm:$0xff]   ;;  %v5447_v30 = vld [vmem:[#allocation2 + $0x4cc] ss:$16 sps:$4 sm:$0xff]  }
  0xc9   :  { %3640 = vmatprep.subr.bf16.mxu0 %v5354_v31  ;;  %4152 = vmatprep.subr.bf16.mxu1 %v5357_v32  ;;  %v5446_v31 = vld [vmem:[#allocation2 + $0x4c0] ss:$16 sps:$4 sm:$0xff]   ;;  %v5449_v32 = vld [vmem:[#allocation2 + $0x4c8] ss:$16 sps:$4 sm:$0xff]  }
  0xcc   :  { %3642 = vmatpush1.bf16.msra.mxu0 %v5356_v33  ;;  %4154 = vmatpush1.bf16.msra.mxu1 %v5359_v34  ;;  %v5450_v33 = vld [vmem:[#allocation2 + $0x4e4] ss:$16 sps:$4 sm:$0xff]   ;;  %v5453_v34 = vld [vmem:[#allocation2 + $0x4ec] ss:$16 sps:$4 sm:$0xff]  }
  0xcd   :  { %3644 = vmatprep.subr.bf16.mxu0 %v5360_v35  ;;  %4156 = vmatprep.subr.bf16.mxu1 %v5363_v36  ;;  %v5452_v35 = vld [vmem:[#allocation2 + $0x4e0] ss:$16 sps:$4 sm:$0xff]   ;;  %v5455_v36 = vld [vmem:[#allocation2 + $0x4e8] ss:$16 sps:$4 sm:$0xff]  }
  0xd0   :  { %3646 = vmatpush1.bf16.msra.mxu0 %v5362_v37  ;;  %4158 = vmatpush1.bf16.msra.mxu1 %v5365_v38  ;;  %v5456_v37 = vld [vmem:[#allocation2 + $0x504] ss:$16 sps:$4 sm:$0xff]   ;;  %v5459_v38 = vld [vmem:[#allocation2 + $0x50c] ss:$16 sps:$4 sm:$0xff]  }
  0xd1   :  { %3648 = vmatprep.subr.bf16.mxu0 %v5366_v39  ;;  %4160 = vmatprep.subr.bf16.mxu1 %v5369_v40  ;;  %v5458_v39 = vld [vmem:[#allocation2 + $0x500] ss:$16 sps:$4 sm:$0xff]   ;;  %v5461_v40 = vld [vmem:[#allocation2 + $0x508] ss:$16 sps:$4 sm:$0xff]  }
  0xd4   :  { %3650 = vmatpush1.bf16.msra.mxu0 %v5368_v41  ;;  %4162 = vmatpush1.bf16.msra.mxu1 %v5371_v42  ;;  %v5462_v41 = vld [vmem:[#allocation2 + $0x524] ss:$16 sps:$4 sm:$0xff]   ;;  %v5465_v42 = vld [vmem:[#allocation2 + $0x52c] ss:$16 sps:$4 sm:$0xff]  }
  0xd5   :  { %3652 = vmatprep.subr.bf16.mxu0 %v5372_v43  ;;  %4164 = vmatprep.subr.bf16.mxu1 %v5375_v44  ;;  %v5464_v43 = vld [vmem:[#allocation2 + $0x520] ss:$16 sps:$4 sm:$0xff]   ;;  %v5467_v44 = vld [vmem:[#allocation2 + $0x528] ss:$16 sps:$4 sm:$0xff]  }
  0xd8   :  { %3654 = vmatpush1.bf16.msra.mxu0 %v5374_v45  ;;  %4166 = vmatpush1.bf16.msra.mxu1 %v5377_v46  ;;  %v5468_v45 = vld [vmem:[#allocation2 + $0x544] ss:$16 sps:$4 sm:$0xff]   ;;  %v5471_v46 = vld [vmem:[#allocation2 + $0x54c] ss:$16 sps:$4 sm:$0xff]  }
  0xd9   :  { %3656 = vmatprep.subr.bf16.mxu0 %v5378_v47  ;;  %4168 = vmatprep.subr.bf16.mxu1 %v5381_v48  ;;  %v5470_v47 = vld [vmem:[#allocation2 + $0x540] ss:$16 sps:$4 sm:$0xff]   ;;  %v5473_v48 = vld [vmem:[#allocation2 + $0x548] ss:$16 sps:$4 sm:$0xff]  }
  0xdc   :  { %3658 = vmatpush1.bf16.msra.mxu0 %v5380_v49  ;;  %4170 = vmatpush1.bf16.msra.mxu1 %v5383_v50  ;;  %v5474_v49 = vld [vmem:[#allocation2 + $0x564] ss:$16 sps:$4 sm:$0xff]   ;;  %v5477_v50 = vld [vmem:[#allocation2 + $0x56c] ss:$16 sps:$4 sm:$0xff]  }
  0xdd   :  { %3660 = vmatprep.subr.bf16.mxu0 %v5384_v51  ;;  %4172 = vmatprep.subr.bf16.mxu1 %v5387_v52  ;;  %v5476_v51 = vld [vmem:[#allocation2 + $0x560] ss:$16 sps:$4 sm:$0xff]   ;;  %v5479_v52 = vld [vmem:[#allocation2 + $0x568] ss:$16 sps:$4 sm:$0xff]  }
  0xe0   :  { %3662 = vmatpush1.bf16.msra.mxu0 %v5386_v53  ;;  %4174 = vmatpush1.bf16.msra.mxu1 %v5389_v54  ;;  %v5480_v53 = vld [vmem:[#allocation2 + $0x584] ss:$16 sps:$4 sm:$0xff]   ;;  %v5483_v54 = vld [vmem:[#allocation2 + $0x58c] ss:$16 sps:$4 sm:$0xff]  }
  0xe1   :  { %3664 = vmatprep.subr.bf16.mxu0 %v5390_v55  ;;  %4176 = vmatprep.subr.bf16.mxu1 %v5393_v56  ;;  %v5482_v55 = vld [vmem:[#allocation2 + $0x580] ss:$16 sps:$4 sm:$0xff]   ;;  %v5485_v56 = vld [vmem:[#allocation2 + $0x588] ss:$16 sps:$4 sm:$0xff]  }
  0xe4   :  { %3666 = vmatpush1.bf16.msra.mxu0 %v5392_v57  ;;  %4178 = vmatpush1.bf16.msra.mxu1 %v5395_v58  ;;  %v5486_v57 = vld [vmem:[#allocation2 + $0x5a4] ss:$16 sps:$4 sm:$0xff]   ;;  %v5489_v58 = vld [vmem:[#allocation2 + $0x5ac] ss:$16 sps:$4 sm:$0xff]  }
  0xe5   :  { %3668 = vmatprep.subr.bf16.mxu0 %v5396_v59  ;;  %4180 = vmatprep.subr.bf16.mxu1 %v5399_v60  ;;  %v5488_v59 = vld [vmem:[#allocation2 + $0x5a0] ss:$16 sps:$4 sm:$0xff]   ;;  %v5491_v60 = vld [vmem:[#allocation2 + $0x5a8] ss:$16 sps:$4 sm:$0xff]  }
  0xe8   :  { %3670 = vmatpush1.bf16.msra.mxu0 %v5398_v61  ;;  %4182 = vmatpush1.bf16.msra.mxu1 %v5401_v62  ;;  %v5492_v61 = vld [vmem:[#allocation2 + $0x5c4] ss:$16 sps:$4 sm:$0xff]   ;;  %v5495_v62 = vld [vmem:[#allocation2 + $0x5cc] ss:$16 sps:$4 sm:$0xff]  }
  0xe9   :  { %3672 = vmatprep.subr.bf16.mxu0 %v5402_v63  ;;  %4184 = vmatprep.subr.bf16.mxu1 %v5405_v0  ;;  %v5494_v63 = vld [vmem:[#allocation2 + $0x5c0] ss:$16 sps:$4 sm:$0xff]   ;;  %v5497_v0 = vld [vmem:[#allocation2 + $0x5c8] ss:$16 sps:$4 sm:$0xff]  }
  0xec   :  { %3674 = vmatpush1.bf16.msra.mxu0 %v5404_v1  ;;  %4186 = vmatpush1.bf16.msra.mxu1 %v5407_v2  ;;  %v5498_v1 = vld [vmem:[#allocation2 + $0x5e4] ss:$16 sps:$4 sm:$0xff]   ;;  %v5501_v2 = vld [vmem:[#allocation2 + $0x5ec] ss:$16 sps:$4 sm:$0xff]  }
  0xed   :  { %3676 = vmatprep.subr.bf16.mxu0 %v5408_v3  ;;  %4188 = vmatprep.subr.bf16.mxu1 %v5411_v4  ;;  %v5500_v3 = vld [vmem:[#allocation2 + $0x5e0] ss:$16 sps:$4 sm:$0xff]   ;;  %v5503_v4 = vld [vmem:[#allocation2 + $0x5e8] ss:$16 sps:$4 sm:$0xff]  }
  0xef   :  { %1817 = vmatmul.mubr.f32.vlgmr.msra.gmra.mrb[0].mxu0 %v109_v7  ;;  %2385 = vmatmul.mubr.f32.vlgmr.msra.gmra.mrb[0].mxu1 %v109_v7  ;;  %v5506_v7 = vld [vmem:[#allocation2 + $0x600] ss:$16 sps:$4 sm:$0xff]  }
  0xf0   :  { %3678 = vmatpush1.bf16.msra.mxu0 %v5410_v5  ;;  %4190 = vmatpush1.bf16.msra.mxu1 %v5413_v6  ;;  %v5504_v5 = vld [vmem:[#allocation2 + $0x604] ss:$16 sps:$4 sm:$0xff]   ;;  %v5507_v6 = vld [vmem:[#allocation2 + $0x60c] ss:$16 sps:$4 sm:$0xff]  }
  0xf1   :  { %3680 = vmatprep.subr.bf16.mxu0 %v5414_v8  ;;  %4192 = vmatprep.subr.bf16.mxu1 %v5417_v9  ;;  %v5509_v8 = vld [vmem:[#allocation2 + $0x608] ss:$16 sps:$4 sm:$0xff]   ;;  %v111_v9 = vld [vmem:[%s6316_s0 + $0x20] sm:$0xff] }
  0xf2   :  { %1887 = vmatprep.mubr.f32.mxu0 %v112_v10  ;;  %2455 = vmatprep.mubr.f32.mxu1 %v112_v10  ;;  %v5510_v10 = vld [vmem:[#allocation2 + $0x624] ss:$16 sps:$4 sm:$0xff]  }
  0xf4   :  { %3682 = vmatpush1.bf16.msra.mxu0 %v5416_v11  ;;  %4194 = vmatpush1.bf16.msra.mxu1 %v5419_v12  ;;  %v5513_v11 = vld [vmem:[#allocation2 + $0x62c] ss:$16 sps:$4 sm:$0xff]   ;;  %v5512_v12 = vld [vmem:[#allocation2 + $0x620] ss:$16 sps:$4 sm:$0xff]  }
  0xf5   :  { %3684 = vmatprep.subr.bf16.mxu0 %v5420_v13  ;;  %4196 = vmatprep.subr.bf16.mxu1 %v5423_v14  ;;  %v5515_v13 = vld [vmem:[#allocation2 + $0x628] ss:$16 sps:$4 sm:$0xff]  }
  0xf6   :  { %v114_v14 = vld [vmem:[%s6316_s0 + $0x38] sm:$0xff] }
  0xf8   :  { %3686 = vmatpush1.bf16.msra.mxu0 %v5422_v15  ;;  %4198 = vmatpush1.bf16.msra.mxu1 %v5425_v16  ;;  %v5516_v15 = vld [vmem:[#allocation2 + $0x644] ss:$16 sps:$4 sm:$0xff]   ;;  %v5519_v16 = vld [vmem:[#allocation2 + $0x64c] ss:$16 sps:$4 sm:$0xff]  }
  0xf9   :  { %3688 = vmatprep.subr.bf16.mxu0 %v5426_v17  ;;  %4200 = vmatprep.subr.bf16.mxu1 %v5429_v18  ;;  %v5518_v17 = vld [vmem:[#allocation2 + $0x640] ss:$16 sps:$4 sm:$0xff]   ;;  %v5521_v18 = vld [vmem:[#allocation2 + $0x648] ss:$16 sps:$4 sm:$0xff]  }
  0xfc   :  { %3690 = vmatpush1.bf16.msra.mxu0 %v5428_v19  ;;  %4202 = vmatpush1.bf16.msra.mxu1 %v5431_v20  ;;  %v5522_v19 = vld [vmem:[#allocation2 + $0x664] ss:$16 sps:$4 sm:$0xff]   ;;  %v5525_v20 = vld [vmem:[#allocation2 + $0x66c] ss:$16 sps:$4 sm:$0xff]  }
  0xfd   :  { %3692 = vmatprep.subr.bf16.mxu0 %v5432_v21  ;;  %4204 = vmatprep.subr.bf16.mxu1 %v5435_v22  ;;  %v5524_v21 = vld [vmem:[#allocation2 + $0x660] ss:$16 sps:$4 sm:$0xff]   ;;  %v5527_v22 = vld [vmem:[#allocation2 + $0x668] ss:$16 sps:$4 sm:$0xff]  }
 0x100   :  { %3694 = vmatpush1.bf16.msra.mxu0 %v5434_v23  ;;  %4206 = vmatpush1.bf16.msra.mxu1 %v5437_v24  ;;  %v5528_v23 = vld [vmem:[#allocation2 + $0x684] ss:$16 sps:$4 sm:$0xff]   ;;  %v5531_v24 = vld [vmem:[#allocation2 + $0x68c] ss:$16 sps:$4 sm:$0xff]  }
 0x101   :  { %3696 = vmatprep.subr.bf16.mxu0 %v5438_v25  ;;  %4208 = vmatprep.subr.bf16.mxu1 %v5441_v26  ;;  %v5530_v25 = vld [vmem:[#allocation2 + $0x680] ss:$16 sps:$4 sm:$0xff]   ;;  %v5533_v26 = vld [vmem:[#allocation2 + $0x688] ss:$16 sps:$4 sm:$0xff]  }
 0x104   :  { %3698 = vmatpush1.bf16.msra.mxu0 %v5440_v27  ;;  %4210 = vmatpush1.bf16.msra.mxu1 %v5443_v28  ;;  %v5534_v27 = vld [vmem:[#allocation2 + $0x6a4] ss:$16 sps:$4 sm:$0xff]   ;;  %v5537_v28 = vld [vmem:[#allocation2 + $0x6ac] ss:$16 sps:$4 sm:$0xff]  }
 0x105   :  { %3700 = vmatprep.subr.bf16.mxu0 %v5444_v29  ;;  %4212 = vmatprep.subr.bf16.mxu1 %v5447_v30  ;;  %v5536_v29 = vld [vmem:[#allocation2 + $0x6a0] ss:$16 sps:$4 sm:$0xff]   ;;  %v5539_v30 = vld [vmem:[#allocation2 + $0x6a8] ss:$16 sps:$4 sm:$0xff]  }
 0x108   :  { %3702 = vmatpush1.bf16.msra.mxu0 %v5446_v31  ;;  %4214 = vmatpush1.bf16.msra.mxu1 %v5449_v32  ;;  %v5540_v31 = vld [vmem:[#allocation2 + $0x6c4] ss:$16 sps:$4 sm:$0xff]   ;;  %v5543_v32 = vld [vmem:[#allocation2 + $0x6cc] ss:$16 sps:$4 sm:$0xff]  }
 0x109   :  { %3704 = vmatprep.subr.bf16.mxu0 %v5450_v33  ;;  %4216 = vmatprep.subr.bf16.mxu1 %v5453_v34  ;;  %v5542_v33 = vld [vmem:[#allocation2 + $0x6c0] ss:$16 sps:$4 sm:$0xff]   ;;  %v5545_v34 = vld [vmem:[#allocation2 + $0x6c8] ss:$16 sps:$4 sm:$0xff]  }
 0x10c   :  { %3706 = vmatpush1.bf16.msra.mxu0 %v5452_v35  ;;  %4218 = vmatpush1.bf16.msra.mxu1 %v5455_v36  ;;  %v5546_v35 = vld [vmem:[#allocation2 + $0x6e4] ss:$16 sps:$4 sm:$0xff]   ;;  %v5549_v36 = vld [vmem:[#allocation2 + $0x6ec] ss:$16 sps:$4 sm:$0xff]  }
 0x10d   :  { %3708 = vmatprep.subr.bf16.mxu0 %v5456_v37  ;;  %4220 = vmatprep.subr.bf16.mxu1 %v5459_v38  ;;  %v5548_v37 = vld [vmem:[#allocation2 + $0x6e0] ss:$16 sps:$4 sm:$0xff]   ;;  %v5551_v38 = vld [vmem:[#allocation2 + $0x6e8] ss:$16 sps:$4 sm:$0xff]  }
 0x110   :  { %3710 = vmatpush1.bf16.msra.mxu0 %v5458_v39  ;;  %4222 = vmatpush1.bf16.msra.mxu1 %v5461_v40  ;;  %v5552_v39 = vld [vmem:[#allocation2 + $0x704] ss:$16 sps:$4 sm:$0xff]   ;;  %v5555_v40 = vld [vmem:[#allocation2 + $0x70c] ss:$16 sps:$4 sm:$0xff]  }
 0x111   :  { %3712 = vmatprep.subr.bf16.mxu0 %v5462_v41  ;;  %4224 = vmatprep.subr.bf16.mxu1 %v5465_v42  ;;  %v5554_v41 = vld [vmem:[#allocation2 + $0x700] ss:$16 sps:$4 sm:$0xff]   ;;  %v5557_v42 = vld [vmem:[#allocation2 + $0x708] ss:$16 sps:$4 sm:$0xff]  }
 0x114   :  { %3714 = vmatpush1.bf16.msra.mxu0 %v5464_v43  ;;  %4226 = vmatpush1.bf16.msra.mxu1 %v5467_v44  ;;  %v5558_v43 = vld [vmem:[#allocation2 + $0x724] ss:$16 sps:$4 sm:$0xff]   ;;  %v5561_v44 = vld [vmem:[#allocation2 + $0x72c] ss:$16 sps:$4 sm:$0xff]  }
 0x115   :  { %3716 = vmatprep.subr.bf16.mxu0 %v5468_v45  ;;  %4228 = vmatprep.subr.bf16.mxu1 %v5471_v46  ;;  %v5560_v45 = vld [vmem:[#allocation2 + $0x720] ss:$16 sps:$4 sm:$0xff]   ;;  %v5563_v46 = vld [vmem:[#allocation2 + $0x728] ss:$16 sps:$4 sm:$0xff]  }
 0x118   :  { %3718 = vmatpush1.bf16.msra.mxu0 %v5470_v47  ;;  %4230 = vmatpush1.bf16.msra.mxu1 %v5473_v48  ;;  %v5564_v47 = vld [vmem:[#allocation2 + $0x744] ss:$16 sps:$4 sm:$0xff]   ;;  %v5567_v48 = vld [vmem:[#allocation2 + $0x74c] ss:$16 sps:$4 sm:$0xff]  }
 0x119   :  { %3720 = vmatprep.subr.bf16.mxu0 %v5474_v49  ;;  %4232 = vmatprep.subr.bf16.mxu1 %v5477_v50  ;;  %v5566_v49 = vld [vmem:[#allocation2 + $0x740] ss:$16 sps:$4 sm:$0xff]   ;;  %v5569_v50 = vld [vmem:[#allocation2 + $0x748] ss:$16 sps:$4 sm:$0xff]  }
 0x11c   :  { %3722 = vmatpush1.bf16.msra.mxu0 %v5476_v51  ;;  %4234 = vmatpush1.bf16.msra.mxu1 %v5479_v52  ;;  %v5570_v51 = vld [vmem:[#allocation2 + $0x764] ss:$16 sps:$4 sm:$0xff]   ;;  %v5573_v52 = vld [vmem:[#allocation2 + $0x76c] ss:$16 sps:$4 sm:$0xff]  }
 0x11d   :  { %3724 = vmatprep.subr.bf16.mxu0 %v5480_v53  ;;  %4236 = vmatprep.subr.bf16.mxu1 %v5483_v54  ;;  %v5572_v53 = vld [vmem:[#allocation2 + $0x760] ss:$16 sps:$4 sm:$0xff]   ;;  %v5575_v54 = vld [vmem:[#allocation2 + $0x768] ss:$16 sps:$4 sm:$0xff]  }
 0x120   :  { %3726 = vmatpush1.bf16.msra.mxu0 %v5482_v55  ;;  %4238 = vmatpush1.bf16.msra.mxu1 %v5485_v56  ;;  %v5576_v55 = vld [vmem:[#allocation2 + $0x784] ss:$16 sps:$4 sm:$0xff]   ;;  %v5579_v56 = vld [vmem:[#allocation2 + $0x78c] ss:$16 sps:$4 sm:$0xff]  }
 0x121   :  { %3728 = vmatprep.subr.bf16.mxu0 %v5486_v57  ;;  %4240 = vmatprep.subr.bf16.mxu1 %v5489_v58  ;;  %v5578_v57 = vld [vmem:[#allocation2 + $0x780] ss:$16 sps:$4 sm:$0xff]   ;;  %v5581_v58 = vld [vmem:[#allocation2 + $0x788] ss:$16 sps:$4 sm:$0xff]  }
 0x124   :  { %3730 = vmatpush1.bf16.msra.mxu0 %v5488_v59  ;;  %4242 = vmatpush1.bf16.msra.mxu1 %v5491_v60  ;;  %v5582_v59 = vld [vmem:[#allocation2 + $0x7a4] ss:$16 sps:$4 sm:$0xff]   ;;  %v5585_v60 = vld [vmem:[#allocation2 + $0x7ac] ss:$16 sps:$4 sm:$0xff]  }
 0x125   :  { %3732 = vmatprep.subr.bf16.mxu0 %v5492_v61  ;;  %4244 = vmatprep.subr.bf16.mxu1 %v5495_v62  ;;  %v5584_v61 = vld [vmem:[#allocation2 + $0x7a0] ss:$16 sps:$4 sm:$0xff]   ;;  %v5587_v62 = vld [vmem:[#allocation2 + $0x7a8] ss:$16 sps:$4 sm:$0xff]  }
 0x128   :  { %3734 = vmatpush1.bf16.msra.mxu0 %v5494_v63  ;;  %4246 = vmatpush1.bf16.msra.mxu1 %v5497_v0  ;;  %v5588_v63 = vld [vmem:[#allocation2 + $0x7c4] ss:$16 sps:$4 sm:$0xff]   ;;  %v5591_v0 = vld [vmem:[#allocation2 + $0x7cc] ss:$16 sps:$4 sm:$0xff]  }
 0x129   :  { %3736 = vmatprep.subr.bf16.mxu0 %v5498_v1  ;;  %4248 = vmatprep.subr.bf16.mxu1 %v5501_v2  ;;  %v5590_v1 = vld [vmem:[#allocation2 + $0x7c0] ss:$16 sps:$4 sm:$0xff]   ;;  %v5593_v2 = vld [vmem:[#allocation2 + $0x7c8] ss:$16 sps:$4 sm:$0xff]  }
 0x12c   :  { %3738 = vmatpush1.bf16.msra.mxu0 %v5500_v3  ;;  %4250 = vmatpush1.bf16.msra.mxu1 %v5503_v4  ;;  %v5594_v3 = vld [vmem:[#allocation2 + $0x7e4] ss:$16 sps:$4 sm:$0xff]   ;;  %v5597_v4 = vld [vmem:[#allocation2 + $0x7ec] ss:$16 sps:$4 sm:$0xff]  }
 0x12d   :  { %3740 = vmatprep.subr.bf16.mxu0 %v5504_v5  ;;  %4252 = vmatprep.subr.bf16.mxu1 %v5507_v6  ;;  %v5596_v5 = vld [vmem:[#allocation2 + $0x7e0] ss:$16 sps:$4 sm:$0xff]   ;;  %v5599_v6 = vld [vmem:[#allocation2 + $0x7e8] ss:$16 sps:$4 sm:$0xff]  }
 0x12f   :  { %1888 = vmatmul.mubr.f32.vlgmr.msra.gmra.mrb[0].mxu0 %v111_v9  ;;  %2456 = vmatmul.mubr.f32.vlgmr.msra.gmra.mrb[0].mxu1 %v111_v9  ;;  %v5602_v9 = vld [vmem:[#allocation2 + $0x800] ss:$16 sps:$4 sm:$0xff]  }
 0x130   :  { %3742 = vmatpush1.bf16.msra.mxu0 %v5506_v7  ;;  %4254 = vmatpush1.bf16.msra.mxu1 %v5509_v8  ;;  %v5600_v7 = vld [vmem:[#allocation2 + $0x804] ss:$16 sps:$4 sm:$0xff]   ;;  %v5603_v8 = vld [vmem:[#allocation2 + $0x80c] ss:$16 sps:$4 sm:$0xff]  }
 0x131   :  { %3744 = vmatprep.subr.bf16.mxu0 %v5510_v10  ;;  %4256 = vmatprep.subr.bf16.mxu1 %v5513_v11  ;;  %v5605_v10 = vld [vmem:[#allocation2 + $0x808] ss:$16 sps:$4 sm:$0xff]   ;;  %v113_v11 = vld [vmem:[%s6316_s0 + $0x30] sm:$0xff] }
 0x132   :  { %1958 = vmatprep.mubr.f32.mxu0 %v114_v14  ;;  %2526 = vmatprep.mubr.f32.mxu1 %v114_v14  ;;  %v5608_v14 = vld [vmem:[#allocation2 + $0x820] ss:$16 sps:$4 sm:$0xff]  }
 0x134   :  { %3746 = vmatpush1.bf16.msra.mxu0 %v5512_v12  ;;  %4258 = vmatpush1.bf16.msra.mxu1 %v5515_v13  ;;  %v5606_v12 = vld [vmem:[#allocation2 + $0x824] ss:$16 sps:$4 sm:$0xff]   ;;  %v5609_v13 = vld [vmem:[#allocation2 + $0x82c] ss:$16 sps:$4 sm:$0xff]  }
 0x135   :  { %3748 = vmatprep.subr.bf16.mxu0 %v5516_v15  ;;  %4260 = vmatprep.subr.bf16.mxu1 %v5519_v16  ;;  %v116_v15 = vld [vmem:[%s6316_s0 + $0x48] sm:$0xff] }
 0x136   :  { %v5611_v16 = vld [vmem:[#allocation2 + $0x828] ss:$16 sps:$4 sm:$0xff]  }
 0x138   :  { %3750 = vmatpush1.bf16.msra.mxu0 %v5518_v17  ;;  %4262 = vmatpush1.bf16.msra.mxu1 %v5521_v18  ;;  %v5612_v17 = vld [vmem:[#allocation2 + $0x844] ss:$16 sps:$4 sm:$0xff]   ;;  %v5615_v18 = vld [vmem:[#allocation2 + $0x84c] ss:$16 sps:$4 sm:$0xff]  }
 0x139   :  { %3752 = vmatprep.subr.bf16.mxu0 %v5522_v19  ;;  %4264 = vmatprep.subr.bf16.mxu1 %v5525_v20  ;;  %v5614_v19 = vld [vmem:[#allocation2 + $0x840] ss:$16 sps:$4 sm:$0xff]   ;;  %v5617_v20 = vld [vmem:[#allocation2 + $0x848] ss:$16 sps:$4 sm:$0xff]  }
 0x13c   :  { %3754 = vmatpush1.bf16.msra.mxu0 %v5524_v21  ;;  %4266 = vmatpush1.bf16.msra.mxu1 %v5527_v22  ;;  %v5618_v21 = vld [vmem:[#allocation2 + $0x864] ss:$16 sps:$4 sm:$0xff]   ;;  %v5621_v22 = vld [vmem:[#allocation2 + $0x86c] ss:$16 sps:$4 sm:$0xff]  }
 0x13d   :  { %3756 = vmatprep.subr.bf16.mxu0 %v5528_v23  ;;  %4268 = vmatprep.subr.bf16.mxu1 %v5531_v24  ;;  %v5620_v23 = vld [vmem:[#allocation2 + $0x860] ss:$16 sps:$4 sm:$0xff]   ;;  %v5623_v24 = vld [vmem:[#allocation2 + $0x868] ss:$16 sps:$4 sm:$0xff]  }
 0x140   :  { %3758 = vmatpush1.bf16.msra.mxu0 %v5530_v25  ;;  %4270 = vmatpush1.bf16.msra.mxu1 %v5533_v26  ;;  %v5624_v25 = vld [vmem:[#allocation2 + $0x884] ss:$16 sps:$4 sm:$0xff]   ;;  %v5627_v26 = vld [vmem:[#allocation2 + $0x88c] ss:$16 sps:$4 sm:$0xff]  }
 0x141   :  { %3760 = vmatprep.subr.bf16.mxu0 %v5534_v27  ;;  %4272 = vmatprep.subr.bf16.mxu1 %v5537_v28  ;;  %v5626_v27 = vld [vmem:[#allocation2 + $0x880] ss:$16 sps:$4 sm:$0xff]   ;;  %v5629_v28 = vld [vmem:[#allocation2 + $0x888] ss:$16 sps:$4 sm:$0xff]  }
 0x144   :  { %3762 = vmatpush1.bf16.msra.mxu0 %v5536_v29  ;;  %4274 = vmatpush1.bf16.msra.mxu1 %v5539_v30  ;;  %v5630_v29 = vld [vmem:[#allocation2 + $0x8a4] ss:$16 sps:$4 sm:$0xff]   ;;  %v5633_v30 = vld [vmem:[#allocation2 + $0x8ac] ss:$16 sps:$4 sm:$0xff]  }
 0x145   :  { %3764 = vmatprep.subr.bf16.mxu0 %v5540_v31  ;;  %4276 = vmatprep.subr.bf16.mxu1 %v5543_v32  ;;  %v5632_v31 = vld [vmem:[#allocation2 + $0x8a0] ss:$16 sps:$4 sm:$0xff]   ;;  %v5635_v32 = vld [vmem:[#allocation2 + $0x8a8] ss:$16 sps:$4 sm:$0xff]  }
 0x148   :  { %3766 = vmatpush1.bf16.msra.mxu0 %v5542_v33  ;;  %4278 = vmatpush1.bf16.msra.mxu1 %v5545_v34  ;;  %v5636_v33 = vld [vmem:[#allocation2 + $0x8c4] ss:$16 sps:$4 sm:$0xff]   ;;  %v5639_v34 = vld [vmem:[#allocation2 + $0x8cc] ss:$16 sps:$4 sm:$0xff]  }
 0x149   :  { %3768 = vmatprep.subr.bf16.mxu0 %v5546_v35  ;;  %4280 = vmatprep.subr.bf16.mxu1 %v5549_v36  ;;  %v5638_v35 = vld [vmem:[#allocation2 + $0x8c0] ss:$16 sps:$4 sm:$0xff]   ;;  %v5641_v36 = vld [vmem:[#allocation2 + $0x8c8] ss:$16 sps:$4 sm:$0xff]  }
 0x14c   :  { %3770 = vmatpush1.bf16.msra.mxu0 %v5548_v37  ;;  %4282 = vmatpush1.bf16.msra.mxu1 %v5551_v38  ;;  %v5642_v37 = vld [vmem:[#allocation2 + $0x8e4] ss:$16 sps:$4 sm:$0xff]   ;;  %v5645_v38 = vld [vmem:[#allocation2 + $0x8ec] ss:$16 sps:$4 sm:$0xff]  }
 0x14d   :  { %3772 = vmatprep.subr.bf16.mxu0 %v5552_v39  ;;  %4284 = vmatprep.subr.bf16.mxu1 %v5555_v40  ;;  %v5644_v39 = vld [vmem:[#allocation2 + $0x8e0] ss:$16 sps:$4 sm:$0xff]   ;;  %v5647_v40 = vld [vmem:[#allocation2 + $0x8e8] ss:$16 sps:$4 sm:$0xff]  }
 0x150   :  { %3774 = vmatpush1.bf16.msra.mxu0 %v5554_v41  ;;  %4286 = vmatpush1.bf16.msra.mxu1 %v5557_v42  ;;  %v5648_v41 = vld [vmem:[#allocation2 + $0x904] ss:$16 sps:$4 sm:$0xff]   ;;  %v5651_v42 = vld [vmem:[#allocation2 + $0x90c] ss:$16 sps:$4 sm:$0xff]  }
 0x151   :  { %3776 = vmatprep.subr.bf16.mxu0 %v5558_v43  ;;  %4288 = vmatprep.subr.bf16.mxu1 %v5561_v44  ;;  %v5650_v43 = vld [vmem:[#allocation2 + $0x900] ss:$16 sps:$4 sm:$0xff]   ;;  %v5653_v44 = vld [vmem:[#allocation2 + $0x908] ss:$16 sps:$4 sm:$0xff]  }
 0x154   :  { %3778 = vmatpush1.bf16.msra.mxu0 %v5560_v45  ;;  %4290 = vmatpush1.bf16.msra.mxu1 %v5563_v46  ;;  %v5654_v45 = vld [vmem:[#allocation2 + $0x924] ss:$16 sps:$4 sm:$0xff]   ;;  %v5657_v46 = vld [vmem:[#allocation2 + $0x92c] ss:$16 sps:$4 sm:$0xff]  }
 0x155   :  { %3780 = vmatprep.subr.bf16.mxu0 %v5564_v47  ;;  %4292 = vmatprep.subr.bf16.mxu1 %v5567_v48  ;;  %v5656_v47 = vld [vmem:[#allocation2 + $0x920] ss:$16 sps:$4 sm:$0xff]   ;;  %v5659_v48 = vld [vmem:[#allocation2 + $0x928] ss:$16 sps:$4 sm:$0xff]  }
 0x158   :  { %3782 = vmatpush1.bf16.msra.mxu0 %v5566_v49  ;;  %4294 = vmatpush1.bf16.msra.mxu1 %v5569_v50  ;;  %v5660_v49 = vld [vmem:[#allocation2 + $0x944] ss:$16 sps:$4 sm:$0xff]   ;;  %v5663_v50 = vld [vmem:[#allocation2 + $0x94c] ss:$16 sps:$4 sm:$0xff]  }
 0x159   :  { %3784 = vmatprep.subr.bf16.mxu0 %v5570_v51  ;;  %4296 = vmatprep.subr.bf16.mxu1 %v5573_v52  ;;  %v5662_v51 = vld [vmem:[#allocation2 + $0x940] ss:$16 sps:$4 sm:$0xff]   ;;  %v5665_v52 = vld [vmem:[#allocation2 + $0x948] ss:$16 sps:$4 sm:$0xff]  }
 0x15c   :  { %3786 = vmatpush1.bf16.msra.mxu0 %v5572_v53  ;;  %4298 = vmatpush1.bf16.msra.mxu1 %v5575_v54  ;;  %v5666_v53 = vld [vmem:[#allocation2 + $0x964] ss:$16 sps:$4 sm:$0xff]   ;;  %v5669_v54 = vld [vmem:[#allocation2 + $0x96c] ss:$16 sps:$4 sm:$0xff]  }
 0x15d   :  { %3788 = vmatprep.subr.bf16.mxu0 %v5576_v55  ;;  %4300 = vmatprep.subr.bf16.mxu1 %v5579_v56  ;;  %v5668_v55 = vld [vmem:[#allocation2 + $0x960] ss:$16 sps:$4 sm:$0xff]   ;;  %v5671_v56 = vld [vmem:[#allocation2 + $0x968] ss:$16 sps:$4 sm:$0xff]  }
 0x160   :  { %3790 = vmatpush1.bf16.msra.mxu0 %v5578_v57  ;;  %4302 = vmatpush1.bf16.msra.mxu1 %v5581_v58  ;;  %v5672_v57 = vld [vmem:[#allocation2 + $0x984] ss:$16 sps:$4 sm:$0xff]   ;;  %v5675_v58 = vld [vmem:[#allocation2 + $0x98c] ss:$16 sps:$4 sm:$0xff]  }
 0x161   :  { %3792 = vmatprep.subr.bf16.mxu0 %v5582_v59  ;;  %4304 = vmatprep.subr.bf16.mxu1 %v5585_v60  ;;  %v5674_v59 = vld [vmem:[#allocation2 + $0x980] ss:$16 sps:$4 sm:$0xff]   ;;  %v5677_v60 = vld [vmem:[#allocation2 + $0x988] ss:$16 sps:$4 sm:$0xff]  }
 0x164   :  { %3794 = vmatpush1.bf16.msra.mxu0 %v5584_v61  ;;  %4306 = vmatpush1.bf16.msra.mxu1 %v5587_v62  ;;  %v5678_v61 = vld [vmem:[#allocation2 + $0x9a4] ss:$16 sps:$4 sm:$0xff]   ;;  %v5681_v62 = vld [vmem:[#allocation2 + $0x9ac] ss:$16 sps:$4 sm:$0xff]  }
 0x165   :  { %3796 = vmatprep.subr.bf16.mxu0 %v5588_v63  ;;  %4308 = vmatprep.subr.bf16.mxu1 %v5591_v0  ;;  %v5680_v63 = vld [vmem:[#allocation2 + $0x9a0] ss:$16 sps:$4 sm:$0xff]   ;;  %v5683_v0 = vld [vmem:[#allocation2 + $0x9a8] ss:$16 sps:$4 sm:$0xff]  }
 0x168   :  { %3798 = vmatpush1.bf16.msra.mxu0 %v5590_v1  ;;  %4310 = vmatpush1.bf16.msra.mxu1 %v5593_v2  ;;  %v5684_v1 = vld [vmem:[#allocation2 + $0x9c4] ss:$16 sps:$4 sm:$0xff]   ;;  %v5687_v2 = vld [vmem:[#allocation2 + $0x9cc] ss:$16 sps:$4 sm:$0xff]  }
 0x169   :  { %3800 = vmatprep.subr.bf16.mxu0 %v5594_v3  ;;  %4312 = vmatprep.subr.bf16.mxu1 %v5597_v4  ;;  %v5686_v3 = vld [vmem:[#allocation2 + $0x9c0] ss:$16 sps:$4 sm:$0xff]   ;;  %v5689_v4 = vld [vmem:[#allocation2 + $0x9c8] ss:$16 sps:$4 sm:$0xff]  }
 0x16c   :  { %3802 = vmatpush1.bf16.msra.mxu0 %v5596_v5  ;;  %4314 = vmatpush1.bf16.msra.mxu1 %v5599_v6  ;;  %v5690_v5 = vld [vmem:[#allocation2 + $0x9e4] ss:$16 sps:$4 sm:$0xff]   ;;  %v5693_v6 = vld [vmem:[#allocation2 + $0x9ec] ss:$16 sps:$4 sm:$0xff]  }
 0x16d   :  { %3804 = vmatprep.subr.bf16.mxu0 %v5600_v7  ;;  %4316 = vmatprep.subr.bf16.mxu1 %v5603_v8  ;;  %v5692_v7 = vld [vmem:[#allocation2 + $0x9e0] ss:$16 sps:$4 sm:$0xff]   ;;  %v5695_v8 = vld [vmem:[#allocation2 + $0x9e8] ss:$16 sps:$4 sm:$0xff]  }
 0x16f   :  { %1959 = vmatmul.mubr.f32.vlgmr.msra.gmra.mrb[0].mxu0 %v113_v11  ;;  %2527 = vmatmul.mubr.f32.vlgmr.msra.gmra.mrb[0].mxu1 %v113_v11  ;;  %v5698_v11 = vld [vmem:[#allocation2 + $0xa00] ss:$16 sps:$4 sm:$0xff]  }
 0x170   :  { %3806 = vmatpush1.bf16.msra.mxu0 %v5602_v9  ;;  %4318 = vmatpush1.bf16.msra.mxu1 %v5605_v10  ;;  %v5696_v9 = vld [vmem:[#allocation2 + $0xa04] ss:$16 sps:$4 sm:$0xff]   ;;  %v5699_v10 = vld [vmem:[#allocation2 + $0xa0c] ss:$16 sps:$4 sm:$0xff]  }
 0x171   :  { %3808 = vmatprep.subr.bf16.mxu0 %v5606_v12  ;;  %4320 = vmatprep.subr.bf16.mxu1 %v5609_v13  ;;  %v5701_v12 = vld [vmem:[#allocation2 + $0xa08] ss:$16 sps:$4 sm:$0xff]   ;;  %v115_v13 = vld [vmem:[%s6316_s0 + $0x40] sm:$0xff] }
 0x172   :  { %2029 = vmatprep.mubr.f32.mxu0 %v116_v15  ;;  %2597 = vmatprep.mubr.f32.mxu1 %v116_v15  ;;  %v5705_v15 = vld [vmem:[#allocation2 + $0xa2c] ss:$16 sps:$4 sm:$0xff]  }
 0x174   :  { %3810 = vmatpush1.bf16.msra.mxu0 %v5608_v14  ;;  %4322 = vmatpush1.bf16.msra.mxu1 %v5611_v16  ;;  %v5702_v14 = vld [vmem:[#allocation2 + $0xa24] ss:$16 sps:$4 sm:$0xff]   ;;  %v5704_v16 = vld [vmem:[#allocation2 + $0xa20] ss:$16 sps:$4 sm:$0xff]  }
 0x175   :  { %3812 = vmatprep.subr.bf16.mxu0 %v5612_v17  ;;  %4324 = vmatprep.subr.bf16.mxu1 %v5615_v18  ;;  %v118_v17 = vld [vmem:[%s6316_s0 + $0x58] sm:$0xff] }
 0x176   :  { %v5707_v18 = vld [vmem:[#allocation2 + $0xa28] ss:$16 sps:$4 sm:$0xff]  }
 0x178   :  { %3814 = vmatpush1.bf16.msra.mxu0 %v5614_v19  ;;  %4326 = vmatpush1.bf16.msra.mxu1 %v5617_v20  ;;  %v5708_v19 = vld [vmem:[#allocation2 + $0xa44] ss:$16 sps:$4 sm:$0xff]   ;;  %v5711_v20 = vld [vmem:[#allocation2 + $0xa4c] ss:$16 sps:$4 sm:$0xff]  }
 0x179   :  { %3816 = vmatprep.subr.bf16.mxu0 %v5618_v21  ;;  %4328 = vmatprep.subr.bf16.mxu1 %v5621_v22  ;;  %v5710_v21 = vld [vmem:[#allocation2 + $0xa40] ss:$16 sps:$4 sm:$0xff]   ;;  %v5713_v22 = vld [vmem:[#allocation2 + $0xa48] ss:$16 sps:$4 sm:$0xff]  }
 0x17c   :  { %3818 = vmatpush1.bf16.msra.mxu0 %v5620_v23  ;;  %4330 = vmatpush1.bf16.msra.mxu1 %v5623_v24  ;;  %v5714_v23 = vld [vmem:[#allocation2 + $0xa64] ss:$16 sps:$4 sm:$0xff]   ;;  %v5717_v24 = vld [vmem:[#allocation2 + $0xa6c] ss:$16 sps:$4 sm:$0xff]  }
 0x17d   :  { %3820 = vmatprep.subr.bf16.mxu0 %v5624_v25  ;;  %4332 = vmatprep.subr.bf16.mxu1 %v5627_v26  ;;  %v5716_v25 = vld [vmem:[#allocation2 + $0xa60] ss:$16 sps:$4 sm:$0xff]   ;;  %v5719_v26 = vld [vmem:[#allocation2 + $0xa68] ss:$16 sps:$4 sm:$0xff]  }
 0x180   :  { %3822 = vmatpush1.bf16.msra.mxu0 %v5626_v27  ;;  %4334 = vmatpush1.bf16.msra.mxu1 %v5629_v28  ;;  %v5720_v27 = vld [vmem:[#allocation2 + $0xa84] ss:$16 sps:$4 sm:$0xff]   ;;  %v5723_v28 = vld [vmem:[#allocation2 + $0xa8c] ss:$16 sps:$4 sm:$0xff]  }
 0x181   :  { %3824 = vmatprep.subr.bf16.mxu0 %v5630_v29  ;;  %4336 = vmatprep.subr.bf16.mxu1 %v5633_v30  ;;  %v5722_v29 = vld [vmem:[#allocation2 + $0xa80] ss:$16 sps:$4 sm:$0xff]   ;;  %v5725_v30 = vld [vmem:[#allocation2 + $0xa88] ss:$16 sps:$4 sm:$0xff]  }
 0x184   :  { %3826 = vmatpush1.bf16.msra.mxu0 %v5632_v31  ;;  %4338 = vmatpush1.bf16.msra.mxu1 %v5635_v32  ;;  %v5726_v31 = vld [vmem:[#allocation2 + $0xaa4] ss:$16 sps:$4 sm:$0xff]   ;;  %v5729_v32 = vld [vmem:[#allocation2 + $0xaac] ss:$16 sps:$4 sm:$0xff]  }
 0x185   :  { %3828 = vmatprep.subr.bf16.mxu0 %v5636_v33  ;;  %4340 = vmatprep.subr.bf16.mxu1 %v5639_v34  ;;  %v5728_v33 = vld [vmem:[#allocation2 + $0xaa0] ss:$16 sps:$4 sm:$0xff]   ;;  %v5731_v34 = vld [vmem:[#allocation2 + $0xaa8] ss:$16 sps:$4 sm:$0xff]  }
 0x188   :  { %3830 = vmatpush1.bf16.msra.mxu0 %v5638_v35  ;;  %4342 = vmatpush1.bf16.msra.mxu1 %v5641_v36  ;;  %v5732_v35 = vld [vmem:[#allocation2 + $0xac4] ss:$16 sps:$4 sm:$0xff]   ;;  %v5735_v36 = vld [vmem:[#allocation2 + $0xacc] ss:$16 sps:$4 sm:$0xff]  }
 0x189   :  { %3832 = vmatprep.subr.bf16.mxu0 %v5642_v37  ;;  %4344 = vmatprep.subr.bf16.mxu1 %v5645_v38  ;;  %v5734_v37 = vld [vmem:[#allocation2 + $0xac0] ss:$16 sps:$4 sm:$0xff]   ;;  %v5737_v38 = vld [vmem:[#allocation2 + $0xac8] ss:$16 sps:$4 sm:$0xff]  }
 0x18c   :  { %3834 = vmatpush1.bf16.msra.mxu0 %v5644_v39  ;;  %4346 = vmatpush1.bf16.msra.mxu1 %v5647_v40  ;;  %v5738_v39 = vld [vmem:[#allocation2 + $0xae4] ss:$16 sps:$4 sm:$0xff]   ;;  %v5741_v40 = vld [vmem:[#allocation2 + $0xaec] ss:$16 sps:$4 sm:$0xff]  }
 0x18d   :  { %3836 = vmatprep.subr.bf16.mxu0 %v5648_v41  ;;  %4348 = vmatprep.subr.bf16.mxu1 %v5651_v42  ;;  %v5740_v41 = vld [vmem:[#allocation2 + $0xae0] ss:$16 sps:$4 sm:$0xff]   ;;  %v5743_v42 = vld [vmem:[#allocation2 + $0xae8] ss:$16 sps:$4 sm:$0xff]  }
 0x190   :  { %3838 = vmatpush1.bf16.msra.mxu0 %v5650_v43  ;;  %4350 = vmatpush1.bf16.msra.mxu1 %v5653_v44  ;;  %v5744_v43 = vld [vmem:[#allocation2 + $0xb04] ss:$16 sps:$4 sm:$0xff]   ;;  %v5747_v44 = vld [vmem:[#allocation2 + $0xb0c] ss:$16 sps:$4 sm:$0xff]  }
 0x191   :  { %3840 = vmatprep.subr.bf16.mxu0 %v5654_v45  ;;  %4352 = vmatprep.subr.bf16.mxu1 %v5657_v46  ;;  %v5746_v45 = vld [vmem:[#allocation2 + $0xb00] ss:$16 sps:$4 sm:$0xff]   ;;  %v5749_v46 = vld [vmem:[#allocation2 + $0xb08] ss:$16 sps:$4 sm:$0xff]  }
 0x194   :  { %3842 = vmatpush1.bf16.msra.mxu0 %v5656_v47  ;;  %4354 = vmatpush1.bf16.msra.mxu1 %v5659_v48  ;;  %v5750_v47 = vld [vmem:[#allocation2 + $0xb24] ss:$16 sps:$4 sm:$0xff]   ;;  %v5753_v48 = vld [vmem:[#allocation2 + $0xb2c] ss:$16 sps:$4 sm:$0xff]  }
 0x195   :  { %3844 = vmatprep.subr.bf16.mxu0 %v5660_v49  ;;  %4356 = vmatprep.subr.bf16.mxu1 %v5663_v50  ;;  %v5752_v49 = vld [vmem:[#allocation2 + $0xb20] ss:$16 sps:$4 sm:$0xff]   ;;  %v5755_v50 = vld [vmem:[#allocation2 + $0xb28] ss:$16 sps:$4 sm:$0xff]  }
 0x198   :  { %3846 = vmatpush1.bf16.msra.mxu0 %v5662_v51  ;;  %4358 = vmatpush1.bf16.msra.mxu1 %v5665_v52  ;;  %v5756_v51 = vld [vmem:[#allocation2 + $0xb44] ss:$16 sps:$4 sm:$0xff]   ;;  %v5759_v52 = vld [vmem:[#allocation2 + $0xb4c] ss:$16 sps:$4 sm:$0xff]  }
 0x199   :  { %3848 = vmatprep.subr.bf16.mxu0 %v5666_v53  ;;  %4360 = vmatprep.subr.bf16.mxu1 %v5669_v54  ;;  %v5758_v53 = vld [vmem:[#allocation2 + $0xb40] ss:$16 sps:$4 sm:$0xff]   ;;  %v5761_v54 = vld [vmem:[#allocation2 + $0xb48] ss:$16 sps:$4 sm:$0xff]  }
 0x19c   :  { %3850 = vmatpush1.bf16.msra.mxu0 %v5668_v55  ;;  %4362 = vmatpush1.bf16.msra.mxu1 %v5671_v56  ;;  %v5762_v55 = vld [vmem:[#allocation2 + $0xb64] ss:$16 sps:$4 sm:$0xff]   ;;  %v5765_v56 = vld [vmem:[#allocation2 + $0xb6c] ss:$16 sps:$4 sm:$0xff]  }
 0x19d   :  { %3852 = vmatprep.subr.bf16.mxu0 %v5672_v57  ;;  %4364 = vmatprep.subr.bf16.mxu1 %v5675_v58  ;;  %v5764_v57 = vld [vmem:[#allocation2 + $0xb60] ss:$16 sps:$4 sm:$0xff]   ;;  %v5767_v58 = vld [vmem:[#allocation2 + $0xb68] ss:$16 sps:$4 sm:$0xff]  }
 0x1a0   :  { %3854 = vmatpush1.bf16.msra.mxu0 %v5674_v59  ;;  %4366 = vmatpush1.bf16.msra.mxu1 %v5677_v60  ;;  %v5768_v59 = vld [vmem:[#allocation2 + $0xb84] ss:$16 sps:$4 sm:$0xff]   ;;  %v5771_v60 = vld [vmem:[#allocation2 + $0xb8c] ss:$16 sps:$4 sm:$0xff]  }
 0x1a1   :  { %3856 = vmatprep.subr.bf16.mxu0 %v5678_v61  ;;  %4368 = vmatprep.subr.bf16.mxu1 %v5681_v62  ;;  %v5770_v61 = vld [vmem:[#allocation2 + $0xb80] ss:$16 sps:$4 sm:$0xff]   ;;  %v5773_v62 = vld [vmem:[#allocation2 + $0xb88] ss:$16 sps:$4 sm:$0xff]  }
 0x1a4   :  { %3858 = vmatpush1.bf16.msra.mxu0 %v5680_v63  ;;  %4370 = vmatpush1.bf16.msra.mxu1 %v5683_v0  ;;  %v5774_v63 = vld [vmem:[#allocation2 + $0xba4] ss:$16 sps:$4 sm:$0xff]   ;;  %v5777_v0 = vld [vmem:[#allocation2 + $0xbac] ss:$16 sps:$4 sm:$0xff]  }
 0x1a5   :  { %3860 = vmatprep.subr.bf16.mxu0 %v5684_v1  ;;  %4372 = vmatprep.subr.bf16.mxu1 %v5687_v2  ;;  %v5776_v1 = vld [vmem:[#allocation2 + $0xba0] ss:$16 sps:$4 sm:$0xff]   ;;  %v5779_v2 = vld [vmem:[#allocation2 + $0xba8] ss:$16 sps:$4 sm:$0xff]  }
 0x1a8   :  { %3862 = vmatpush1.bf16.msra.mxu0 %v5686_v3  ;;  %4374 = vmatpush1.bf16.msra.mxu1 %v5689_v4  ;;  %v5780_v3 = vld [vmem:[#allocation2 + $0xbc4] ss:$16 sps:$4 sm:$0xff]   ;;  %v5783_v4 = vld [vmem:[#allocation2 + $0xbcc] ss:$16 sps:$4 sm:$0xff]  }
 0x1a9   :  { %3864 = vmatprep.subr.bf16.mxu0 %v5690_v5  ;;  %4376 = vmatprep.subr.bf16.mxu1 %v5693_v6  ;;  %v5782_v5 = vld [vmem:[#allocation2 + $0xbc0] ss:$16 sps:$4 sm:$0xff]   ;;  %v5785_v6 = vld [vmem:[#allocation2 + $0xbc8] ss:$16 sps:$4 sm:$0xff]  }
 0x1ac   :  { %3866 = vmatpush1.bf16.msra.mxu0 %v5692_v7  ;;  %4378 = vmatpush1.bf16.msra.mxu1 %v5695_v8  ;;  %v5786_v7 = vld [vmem:[#allocation2 + $0xbe4] ss:$16 sps:$4 sm:$0xff]   ;;  %v5789_v8 = vld [vmem:[#allocation2 + $0xbec] ss:$16 sps:$4 sm:$0xff]  }
 0x1ad   :  { %3868 = vmatprep.subr.bf16.mxu0 %v5696_v9  ;;  %4380 = vmatprep.subr.bf16.mxu1 %v5699_v10  ;;  %v5788_v9 = vld [vmem:[#allocation2 + $0xbe0] ss:$16 sps:$4 sm:$0xff]   ;;  %v5791_v10 = vld [vmem:[#allocation2 + $0xbe8] ss:$16 sps:$4 sm:$0xff]  }
 0x1af   :  { %2030 = vmatmul.mubr.f32.vlgmr.msra.gmra.mrb[0].mxu0 %v115_v13  ;;  %2598 = vmatmul.mubr.f32.vlgmr.msra.gmra.mrb[0].mxu1 %v115_v13  ;;  %v5794_v13 = vld [vmem:[#allocation2 + $0xc00] ss:$16 sps:$4 sm:$0xff]  }
 0x1b0   :  { %3870 = vmatpush1.bf16.msra.mxu0 %v5698_v11  ;;  %4382 = vmatpush1.bf16.msra.mxu1 %v5701_v12  ;;  %v5792_v11 = vld [vmem:[#allocation2 + $0xc04] ss:$16 sps:$4 sm:$0xff]   ;;  %v5795_v12 = vld [vmem:[#allocation2 + $0xc0c] ss:$16 sps:$4 sm:$0xff]  }
 0x1b1   :  { %3872 = vmatprep.subr.bf16.mxu0 %v5702_v14  ;;  %4384 = vmatprep.subr.bf16.mxu1 %v5705_v15  ;;  %v5797_v14 = vld [vmem:[#allocation2 + $0xc08] ss:$16 sps:$4 sm:$0xff]   ;;  %v117_v15 = vld [vmem:[%s6316_s0 + $0x50] sm:$0xff] }
 0x1b2   :  { %2100 = vmatprep.mubr.f32.mxu0 %v118_v17  ;;  %2668 = vmatprep.mubr.f32.mxu1 %v118_v17  ;;  %v5801_v17 = vld [vmem:[#allocation2 + $0xc2c] ss:$16 sps:$4 sm:$0xff]  }
 0x1b4   :  { %3874 = vmatpush1.bf16.msra.mxu0 %v5704_v16  ;;  %4386 = vmatpush1.bf16.msra.mxu1 %v5707_v18  ;;  %v5798_v16 = vld [vmem:[#allocation2 + $0xc24] ss:$16 sps:$4 sm:$0xff]   ;;  %v120_v18 = vld [vmem:[%s6316_s0 + $0x68] sm:$0xff] }
 0x1b5   :  { %3876 = vmatprep.subr.bf16.mxu0 %v5708_v19  ;;  %4388 = vmatprep.subr.bf16.mxu1 %v5711_v20  ;;  %v5800_v19 = vld [vmem:[#allocation2 + $0xc20] ss:$16 sps:$4 sm:$0xff]   ;;  %v5803_v20 = vld [vmem:[#allocation2 + $0xc28] ss:$16 sps:$4 sm:$0xff]  }
 0x1b8   :  { %3878 = vmatpush1.bf16.msra.mxu0 %v5710_v21  ;;  %4390 = vmatpush1.bf16.msra.mxu1 %v5713_v22  ;;  %v5804_v21 = vld [vmem:[#allocation2 + $0xc44] ss:$16 sps:$4 sm:$0xff]   ;;  %v5807_v22 = vld [vmem:[#allocation2 + $0xc4c] ss:$16 sps:$4 sm:$0xff]  }
 0x1b9   :  { %3880 = vmatprep.subr.bf16.mxu0 %v5714_v23  ;;  %4392 = vmatprep.subr.bf16.mxu1 %v5717_v24  ;;  %v5806_v23 = vld [vmem:[#allocation2 + $0xc40] ss:$16 sps:$4 sm:$0xff]   ;;  %v5809_v24 = vld [vmem:[#allocation2 + $0xc48] ss:$16 sps:$4 sm:$0xff]  }
 0x1bc   :  { %3882 = vmatpush1.bf16.msra.mxu0 %v5716_v25  ;;  %4394 = vmatpush1.bf16.msra.mxu1 %v5719_v26  ;;  %v5810_v25 = vld [vmem:[#allocation2 + $0xc64] ss:$16 sps:$4 sm:$0xff]   ;;  %v5813_v26 = vld [vmem:[#allocation2 + $0xc6c] ss:$16 sps:$4 sm:$0xff]  }
 0x1bd   :  { %3884 = vmatprep.subr.bf16.mxu0 %v5720_v27  ;;  %4396 = vmatprep.subr.bf16.mxu1 %v5723_v28  ;;  %v5812_v27 = vld [vmem:[#allocation2 + $0xc60] ss:$16 sps:$4 sm:$0xff]   ;;  %v5815_v28 = vld [vmem:[#allocation2 + $0xc68] ss:$16 sps:$4 sm:$0xff]  }
 0x1c0   :  { %3886 = vmatpush1.bf16.msra.mxu0 %v5722_v29  ;;  %4398 = vmatpush1.bf16.msra.mxu1 %v5725_v30  ;;  %v5816_v29 = vld [vmem:[#allocation2 + $0xc84] ss:$16 sps:$4 sm:$0xff]   ;;  %v5819_v30 = vld [vmem:[#allocation2 + $0xc8c] ss:$16 sps:$4 sm:$0xff]  }
 0x1c1   :  { %3888 = vmatprep.subr.bf16.mxu0 %v5726_v31  ;;  %4400 = vmatprep.subr.bf16.mxu1 %v5729_v32  ;;  %v5818_v31 = vld [vmem:[#allocation2 + $0xc80] ss:$16 sps:$4 sm:$0xff]   ;;  %v5821_v32 = vld [vmem:[#allocation2 + $0xc88] ss:$16 sps:$4 sm:$0xff]  }
 0x1c4   :  { %3890 = vmatpush1.bf16.msra.mxu0 %v5728_v33  ;;  %4402 = vmatpush1.bf16.msra.mxu1 %v5731_v34  ;;  %v5822_v33 = vld [vmem:[#allocation2 + $0xca4] ss:$16 sps:$4 sm:$0xff]   ;;  %v5825_v34 = vld [vmem:[#allocation2 + $0xcac] ss:$16 sps:$4 sm:$0xff]  }
 0x1c5   :  { %3892 = vmatprep.subr.bf16.mxu0 %v5732_v35  ;;  %4404 = vmatprep.subr.bf16.mxu1 %v5735_v36  ;;  %v5824_v35 = vld [vmem:[#allocation2 + $0xca0] ss:$16 sps:$4 sm:$0xff]   ;;  %v5827_v36 = vld [vmem:[#allocation2 + $0xca8] ss:$16 sps:$4 sm:$0xff]  }
 0x1c8   :  { %3894 = vmatpush1.bf16.msra.mxu0 %v5734_v37  ;;  %4406 = vmatpush1.bf16.msra.mxu1 %v5737_v38  ;;  %v5828_v37 = vld [vmem:[#allocation2 + $0xcc4] ss:$16 sps:$4 sm:$0xff]   ;;  %v5831_v38 = vld [vmem:[#allocation2 + $0xccc] ss:$16 sps:$4 sm:$0xff]  }
 0x1c9   :  { %3896 = vmatprep.subr.bf16.mxu0 %v5738_v39  ;;  %4408 = vmatprep.subr.bf16.mxu1 %v5741_v40  ;;  %v5830_v39 = vld [vmem:[#allocation2 + $0xcc0] ss:$16 sps:$4 sm:$0xff]   ;;  %v5833_v40 = vld [vmem:[#allocation2 + $0xcc8] ss:$16 sps:$4 sm:$0xff]  }
 0x1cc   :  { %3898 = vmatpush1.bf16.msra.mxu0 %v5740_v41  ;;  %4410 = vmatpush1.bf16.msra.mxu1 %v5743_v42  ;;  %v5834_v41 = vld [vmem:[#allocation2 + $0xce4] ss:$16 sps:$4 sm:$0xff]   ;;  %v5837_v42 = vld [vmem:[#allocation2 + $0xcec] ss:$16 sps:$4 sm:$0xff]  }
 0x1cd   :  { %3900 = vmatprep.subr.bf16.mxu0 %v5744_v43  ;;  %4412 = vmatprep.subr.bf16.mxu1 %v5747_v44  ;;  %v5836_v43 = vld [vmem:[#allocation2 + $0xce0] ss:$16 sps:$4 sm:$0xff]   ;;  %v5839_v44 = vld [vmem:[#allocation2 + $0xce8] ss:$16 sps:$4 sm:$0xff]  }
 0x1d0   :  { %3902 = vmatpush1.bf16.msra.mxu0 %v5746_v45  ;;  %4414 = vmatpush1.bf16.msra.mxu1 %v5749_v46  ;;  %v5840_v45 = vld [vmem:[#allocation2 + $0xd04] ss:$16 sps:$4 sm:$0xff]   ;;  %v5843_v46 = vld [vmem:[#allocation2 + $0xd0c] ss:$16 sps:$4 sm:$0xff]  }
 0x1d1   :  { %3904 = vmatprep.subr.bf16.mxu0 %v5750_v47  ;;  %4416 = vmatprep.subr.bf16.mxu1 %v5753_v48  ;;  %v5842_v47 = vld [vmem:[#allocation2 + $0xd00] ss:$16 sps:$4 sm:$0xff]   ;;  %v5845_v48 = vld [vmem:[#allocation2 + $0xd08] ss:$16 sps:$4 sm:$0xff]  }
 0x1d4   :  { %3906 = vmatpush1.bf16.msra.mxu0 %v5752_v49  ;;  %4418 = vmatpush1.bf16.msra.mxu1 %v5755_v50  ;;  %v5846_v49 = vld [vmem:[#allocation2 + $0xd24] ss:$16 sps:$4 sm:$0xff]   ;;  %v5849_v50 = vld [vmem:[#allocation2 + $0xd2c] ss:$16 sps:$4 sm:$0xff]  }
 0x1d5   :  { %3908 = vmatprep.subr.bf16.mxu0 %v5756_v51  ;;  %4420 = vmatprep.subr.bf16.mxu1 %v5759_v52  ;;  %v5848_v51 = vld [vmem:[#allocation2 + $0xd20] ss:$16 sps:$4 sm:$0xff]   ;;  %v5851_v52 = vld [vmem:[#allocation2 + $0xd28] ss:$16 sps:$4 sm:$0xff]  }
 0x1d8   :  { %3910 = vmatpush1.bf16.msra.mxu0 %v5758_v53  ;;  %4422 = vmatpush1.bf16.msra.mxu1 %v5761_v54  ;;  %v5852_v53 = vld [vmem:[#allocation2 + $0xd44] ss:$16 sps:$4 sm:$0xff]   ;;  %v5855_v54 = vld [vmem:[#allocation2 + $0xd4c] ss:$16 sps:$4 sm:$0xff]  }
 0x1d9   :  { %3912 = vmatprep.subr.bf16.mxu0 %v5762_v55  ;;  %4424 = vmatprep.subr.bf16.mxu1 %v5765_v56  ;;  %v5854_v55 = vld [vmem:[#allocation2 + $0xd40] ss:$16 sps:$4 sm:$0xff]   ;;  %v5857_v56 = vld [vmem:[#allocation2 + $0xd48] ss:$16 sps:$4 sm:$0xff]  }
 0x1dc   :  { %3914 = vmatpush1.bf16.msra.mxu0 %v5764_v57  ;;  %4426 = vmatpush1.bf16.msra.mxu1 %v5767_v58  ;;  %v5858_v57 = vld [vmem:[#allocation2 + $0xd64] ss:$16 sps:$4 sm:$0xff]   ;;  %v5861_v58 = vld [vmem:[#allocation2 + $0xd6c] ss:$16 sps:$4 sm:$0xff]  }
 0x1dd   :  { %3916 = vmatprep.subr.bf16.mxu0 %v5768_v59  ;;  %4428 = vmatprep.subr.bf16.mxu1 %v5771_v60  ;;  %v5860_v59 = vld [vmem:[#allocation2 + $0xd60] ss:$16 sps:$4 sm:$0xff]   ;;  %v5863_v60 = vld [vmem:[#allocation2 + $0xd68] ss:$16 sps:$4 sm:$0xff]  }
 0x1e0   :  { %3918 = vmatpush1.bf16.msra.mxu0 %v5770_v61  ;;  %4430 = vmatpush1.bf16.msra.mxu1 %v5773_v62  ;;  %v5864_v61 = vld [vmem:[#allocation2 + $0xd84] ss:$16 sps:$4 sm:$0xff]   ;;  %v5867_v62 = vld [vmem:[#allocation2 + $0xd8c] ss:$16 sps:$4 sm:$0xff]  }
 0x1e1   :  { %3920 = vmatprep.subr.bf16.mxu0 %v5774_v63  ;;  %4432 = vmatprep.subr.bf16.mxu1 %v5777_v0  ;;  %v5866_v63 = vld [vmem:[#allocation2 + $0xd80] ss:$16 sps:$4 sm:$0xff]   ;;  %v5869_v0 = vld [vmem:[#allocation2 + $0xd88] ss:$16 sps:$4 sm:$0xff]  }
 0x1e4   :  { %3922 = vmatpush1.bf16.msra.mxu0 %v5776_v1  ;;  %4434 = vmatpush1.bf16.msra.mxu1 %v5779_v2  ;;  %v5870_v1 = vld [vmem:[#allocation2 + $0xda4] ss:$16 sps:$4 sm:$0xff]   ;;  %v5873_v2 = vld [vmem:[#allocation2 + $0xdac] ss:$16 sps:$4 sm:$0xff]  }
 0x1e5   :  { %3924 = vmatprep.subr.bf16.mxu0 %v5780_v3  ;;  %4436 = vmatprep.subr.bf16.mxu1 %v5783_v4  ;;  %v5872_v3 = vld [vmem:[#allocation2 + $0xda0] ss:$16 sps:$4 sm:$0xff]   ;;  %v5875_v4 = vld [vmem:[#allocation2 + $0xda8] ss:$16 sps:$4 sm:$0xff]  }
 0x1e8   :  { %3926 = vmatpush1.bf16.msra.mxu0 %v5782_v5  ;;  %4438 = vmatpush1.bf16.msra.mxu1 %v5785_v6  ;;  %v5876_v5 = vld [vmem:[#allocation2 + $0xdc4] ss:$16 sps:$4 sm:$0xff]   ;;  %v5879_v6 = vld [vmem:[#allocation2 + $0xdcc] ss:$16 sps:$4 sm:$0xff]  }
 0x1e9   :  { %3928 = vmatprep.subr.bf16.mxu0 %v5786_v7  ;;  %4440 = vmatprep.subr.bf16.mxu1 %v5789_v8  ;;  %v5878_v7 = vld [vmem:[#allocation2 + $0xdc0] ss:$16 sps:$4 sm:$0xff]   ;;  %v5881_v8 = vld [vmem:[#allocation2 + $0xdc8] ss:$16 sps:$4 sm:$0xff]  }
 0x1ec   :  { %3930 = vmatpush1.bf16.msra.mxu0 %v5788_v9  ;;  %4442 = vmatpush1.bf16.msra.mxu1 %v5791_v10  ;;  %v5882_v9 = vld [vmem:[#allocation2 + $0xde4] ss:$16 sps:$4 sm:$0xff]   ;;  %v5885_v10 = vld [vmem:[#allocation2 + $0xdec] ss:$16 sps:$4 sm:$0xff]  }
 0x1ed   :  { %3932 = vmatprep.subr.bf16.mxu0 %v5792_v11  ;;  %4444 = vmatprep.subr.bf16.mxu1 %v5795_v12  ;;  %v5884_v11 = vld [vmem:[#allocation2 + $0xde0] ss:$16 sps:$4 sm:$0xff]   ;;  %v5887_v12 = vld [vmem:[#allocation2 + $0xde8] ss:$16 sps:$4 sm:$0xff]  }
 0x1ef   :  { %2101 = vmatmul.mubr.f32.vlgmr.msra.gmra.mrb[0].mxu0 %v117_v15  ;;  %2669 = vmatmul.mubr.f32.vlgmr.msra.gmra.mrb[0].mxu1 %v117_v15  ;;  %v5890_v15 = vld [vmem:[#allocation2 + $0xe00] ss:$16 sps:$4 sm:$0xff]  }
 0x1f0   :  { %3934 = vmatpush1.bf16.msra.mxu0 %v5794_v13  ;;  %4446 = vmatpush1.bf16.msra.mxu1 %v5797_v14  ;;  %v5888_v13 = vld [vmem:[#allocation2 + $0xe04] ss:$16 sps:$4 sm:$0xff]   ;;  %v5891_v14 = vld [vmem:[#allocation2 + $0xe0c] ss:$16 sps:$4 sm:$0xff]  }
 0x1f1   :  { %3936 = vmatprep.subr.bf16.mxu0 %v5798_v16  ;;  %4448 = vmatprep.subr.bf16.mxu1 %v5801_v17  ;;  %v5893_v16 = vld [vmem:[#allocation2 + $0xe08] ss:$16 sps:$4 sm:$0xff]   ;;  %v119_v17 = vld [vmem:[%s6316_s0 + $0x60] sm:$0xff] }
 0x1f2   :  { %2171 = vmatprep.mubr.f32.mxu0 %v120_v18  ;;  %2739 = vmatprep.mubr.f32.mxu1 %v120_v18  ;;  %v5894_v18 = vld [vmem:[#allocation2 + $0xe24] ss:$16 sps:$4 sm:$0xff]  }
 0x1f4   :  { %3938 = vmatpush1.bf16.msra.mxu0 %v5800_v19  ;;  %4450 = vmatpush1.bf16.msra.mxu1 %v5803_v20  ;;  %v5897_v19 = vld [vmem:[#allocation2 + $0xe2c] ss:$16 sps:$4 sm:$0xff]  }
 0x1f5   :  { %3940 = vmatprep.subr.bf16.mxu0 %v5804_v21  ;;  %4452 = vmatprep.subr.bf16.mxu1 %v5807_v22  ;;  %v122_v20 = vld [vmem:[%s6316_s0 + $0x78] sm:$0xff]  ;;  %v5896_v21 = vld [vmem:[#allocation2 + $0xe20] ss:$16 sps:$4 sm:$0xff]  }
 0x1f6   :  { %v5899_v22 = vld [vmem:[#allocation2 + $0xe28] ss:$16 sps:$4 sm:$0xff]  }
 0x1f8   :  { %3942 = vmatpush1.bf16.msra.mxu0 %v5806_v23  ;;  %4454 = vmatpush1.bf16.msra.mxu1 %v5809_v24  ;;  %v5900_v23 = vld [vmem:[#allocation2 + $0xe44] ss:$16 sps:$4 sm:$0xff]   ;;  %v5903_v24 = vld [vmem:[#allocation2 + $0xe4c] ss:$16 sps:$4 sm:$0xff]  }
 0x1f9   :  { %3944 = vmatprep.subr.bf16.mxu0 %v5810_v25  ;;  %4456 = vmatprep.subr.bf16.mxu1 %v5813_v26  ;;  %v5902_v25 = vld [vmem:[#allocation2 + $0xe40] ss:$16 sps:$4 sm:$0xff]   ;;  %v5905_v26 = vld [vmem:[#allocation2 + $0xe48] ss:$16 sps:$4 sm:$0xff]  }
 0x1fc   :  { %3946 = vmatpush1.bf16.msra.mxu0 %v5812_v27  ;;  %4458 = vmatpush1.bf16.msra.mxu1 %v5815_v28  ;;  %v5906_v27 = vld [vmem:[#allocation2 + $0xe64] ss:$16 sps:$4 sm:$0xff]   ;;  %v5909_v28 = vld [vmem:[#allocation2 + $0xe6c] ss:$16 sps:$4 sm:$0xff]  }
 0x1fd   :  { %3948 = vmatprep.subr.bf16.mxu0 %v5816_v29  ;;  %4460 = vmatprep.subr.bf16.mxu1 %v5819_v30  ;;  %v5908_v29 = vld [vmem:[#allocation2 + $0xe60] ss:$16 sps:$4 sm:$0xff]   ;;  %v5911_v30 = vld [vmem:[#allocation2 + $0xe68] ss:$16 sps:$4 sm:$0xff]  }
 0x200   :  { %3950 = vmatpush1.bf16.msra.mxu0 %v5818_v31  ;;  %4462 = vmatpush1.bf16.msra.mxu1 %v5821_v32  ;;  %v5912_v31 = vld [vmem:[#allocation2 + $0xe84] ss:$16 sps:$4 sm:$0xff]   ;;  %v5915_v32 = vld [vmem:[#allocation2 + $0xe8c] ss:$16 sps:$4 sm:$0xff]  }
 0x201   :  { %3952 = vmatprep.subr.bf16.mxu0 %v5822_v33  ;;  %4464 = vmatprep.subr.bf16.mxu1 %v5825_v34  ;;  %v5914_v33 = vld [vmem:[#allocation2 + $0xe80] ss:$16 sps:$4 sm:$0xff]   ;;  %v5917_v34 = vld [vmem:[#allocation2 + $0xe88] ss:$16 sps:$4 sm:$0xff]  }
 0x204   :  { %3954 = vmatpush1.bf16.msra.mxu0 %v5824_v35  ;;  %4466 = vmatpush1.bf16.msra.mxu1 %v5827_v36  ;;  %v5918_v35 = vld [vmem:[#allocation2 + $0xea4] ss:$16 sps:$4 sm:$0xff]   ;;  %v5921_v36 = vld [vmem:[#allocation2 + $0xeac] ss:$16 sps:$4 sm:$0xff]  }
 0x205   :  { %3956 = vmatprep.subr.bf16.mxu0 %v5828_v37  ;;  %4468 = vmatprep.subr.bf16.mxu1 %v5831_v38  ;;  %v5920_v37 = vld [vmem:[#allocation2 + $0xea0] ss:$16 sps:$4 sm:$0xff]   ;;  %v5923_v38 = vld [vmem:[#allocation2 + $0xea8] ss:$16 sps:$4 sm:$0xff]  }
 0x208   :  { %3958 = vmatpush1.bf16.msra.mxu0 %v5830_v39  ;;  %4470 = vmatpush1.bf16.msra.mxu1 %v5833_v40  ;;  %v5924_v39 = vld [vmem:[#allocation2 + $0xec4] ss:$16 sps:$4 sm:$0xff]   ;;  %v5927_v40 = vld [vmem:[#allocation2 + $0xecc] ss:$16 sps:$4 sm:$0xff]  }
 0x209   :  { %3960 = vmatprep.subr.bf16.mxu0 %v5834_v41  ;;  %4472 = vmatprep.subr.bf16.mxu1 %v5837_v42  ;;  %v5926_v41 = vld [vmem:[#allocation2 + $0xec0] ss:$16 sps:$4 sm:$0xff]   ;;  %v5929_v42 = vld [vmem:[#allocation2 + $0xec8] ss:$16 sps:$4 sm:$0xff]  }
 0x20c   :  { %3962 = vmatpush1.bf16.msra.mxu0 %v5836_v43  ;;  %4474 = vmatpush1.bf16.msra.mxu1 %v5839_v44  ;;  %v5930_v43 = vld [vmem:[#allocation2 + $0xee4] ss:$16 sps:$4 sm:$0xff]   ;;  %v5933_v44 = vld [vmem:[#allocation2 + $0xeec] ss:$16 sps:$4 sm:$0xff]  }
 0x20d   :  { %3964 = vmatprep.subr.bf16.mxu0 %v5840_v45  ;;  %4476 = vmatprep.subr.bf16.mxu1 %v5843_v46  ;;  %v5932_v45 = vld [vmem:[#allocation2 + $0xee0] ss:$16 sps:$4 sm:$0xff]   ;;  %v5935_v46 = vld [vmem:[#allocation2 + $0xee8] ss:$16 sps:$4 sm:$0xff]  }
 0x210   :  { %3966 = vmatpush1.bf16.msra.mxu0 %v5842_v47  ;;  %4478 = vmatpush1.bf16.msra.mxu1 %v5845_v48  ;;  %v5936_v47 = vld [vmem:[#allocation2 + $0xf04] ss:$16 sps:$4 sm:$0xff]   ;;  %v5939_v48 = vld [vmem:[#allocation2 + $0xf0c] ss:$16 sps:$4 sm:$0xff]  }
 0x211   :  { %3968 = vmatprep.subr.bf16.mxu0 %v5846_v49  ;;  %4480 = vmatprep.subr.bf16.mxu1 %v5849_v50  ;;  %v5938_v49 = vld [vmem:[#allocation2 + $0xf00] ss:$16 sps:$4 sm:$0xff]   ;;  %v5941_v50 = vld [vmem:[#allocation2 + $0xf08] ss:$16 sps:$4 sm:$0xff]  }
 0x214   :  { %3970 = vmatpush1.bf16.msra.mxu0 %v5848_v51  ;;  %4482 = vmatpush1.bf16.msra.mxu1 %v5851_v52  ;;  %v5942_v51 = vld [vmem:[#allocation2 + $0xf24] ss:$16 sps:$4 sm:$0xff]   ;;  %v5945_v52 = vld [vmem:[#allocation2 + $0xf2c] ss:$16 sps:$4 sm:$0xff]  }
 0x215   :  { %3972 = vmatprep.subr.bf16.mxu0 %v5852_v53  ;;  %4484 = vmatprep.subr.bf16.mxu1 %v5855_v54  ;;  %v5944_v53 = vld [vmem:[#allocation2 + $0xf20] ss:$16 sps:$4 sm:$0xff]   ;;  %v5947_v54 = vld [vmem:[#allocation2 + $0xf28] ss:$16 sps:$4 sm:$0xff]  }
 0x218   :  { %3974 = vmatpush1.bf16.msra.mxu0 %v5854_v55  ;;  %4486 = vmatpush1.bf16.msra.mxu1 %v5857_v56  ;;  %v5948_v55 = vld [vmem:[#allocation2 + $0xf44] ss:$16 sps:$4 sm:$0xff]   ;;  %v5951_v56 = vld [vmem:[#allocation2 + $0xf4c] ss:$16 sps:$4 sm:$0xff]  }
 0x219   :  { %3976 = vmatprep.subr.bf16.mxu0 %v5858_v57  ;;  %4488 = vmatprep.subr.bf16.mxu1 %v5861_v58  ;;  %v5950_v57 = vld [vmem:[#allocation2 + $0xf40] ss:$16 sps:$4 sm:$0xff]   ;;  %v5953_v58 = vld [vmem:[#allocation2 + $0xf48] ss:$16 sps:$4 sm:$0xff]  }
 0x21c   :  { %3978 = vmatpush1.bf16.msra.mxu0 %v5860_v59  ;;  %4490 = vmatpush1.bf16.msra.mxu1 %v5863_v60  ;;  %v5954_v59 = vld [vmem:[#allocation2 + $0xf64] ss:$16 sps:$4 sm:$0xff]   ;;  %v5957_v60 = vld [vmem:[#allocation2 + $0xf6c] ss:$16 sps:$4 sm:$0xff]  }
 0x21d   :  { %3980 = vmatprep.subr.bf16.mxu0 %v5864_v61  ;;  %4492 = vmatprep.subr.bf16.mxu1 %v5867_v62  ;;  %v5956_v61 = vld [vmem:[#allocation2 + $0xf60] ss:$16 sps:$4 sm:$0xff]   ;;  %v5959_v62 = vld [vmem:[#allocation2 + $0xf68] ss:$16 sps:$4 sm:$0xff]  }
 0x220   :  { %3982 = vmatpush1.bf16.msra.mxu0 %v5866_v63  ;;  %4494 = vmatpush1.bf16.msra.mxu1 %v5869_v0  ;;  %v5960_v63 = vld [vmem:[#allocation2 + $0xf84] ss:$16 sps:$4 sm:$0xff]   ;;  %v5963_v0 = vld [vmem:[#allocation2 + $0xf8c] ss:$16 sps:$4 sm:$0xff]  }
 0x221   :  { %3984 = vmatprep.subr.bf16.mxu0 %v5870_v1  ;;  %4496 = vmatprep.subr.bf16.mxu1 %v5873_v2  ;;  %v5962_v1 = vld [vmem:[#allocation2 + $0xf80] ss:$16 sps:$4 sm:$0xff]   ;;  %v5965_v2 = vld [vmem:[#allocation2 + $0xf88] ss:$16 sps:$4 sm:$0xff]  }
 0x224   :  { %3986 = vmatpush1.bf16.msra.mxu0 %v5872_v3  ;;  %4498 = vmatpush1.bf16.msra.mxu1 %v5875_v4  ;;  %v5966_v3 = vld [vmem:[#allocation2 + $0xfa4] ss:$16 sps:$4 sm:$0xff]   ;;  %v5969_v4 = vld [vmem:[#allocation2 + $0xfac] ss:$16 sps:$4 sm:$0xff]  }
 0x225   :  { %3988 = vmatprep.subr.bf16.mxu0 %v5876_v5  ;;  %4500 = vmatprep.subr.bf16.mxu1 %v5879_v6  ;;  %v5968_v5 = vld [vmem:[#allocation2 + $0xfa0] ss:$16 sps:$4 sm:$0xff]   ;;  %v5971_v6 = vld [vmem:[#allocation2 + $0xfa8] ss:$16 sps:$4 sm:$0xff]  }
 0x228   :  { %3990 = vmatpush1.bf16.msra.mxu0 %v5878_v7  ;;  %4502 = vmatpush1.bf16.msra.mxu1 %v5881_v8  ;;  %v5972_v7 = vld [vmem:[#allocation2 + $0xfc4] ss:$16 sps:$4 sm:$0xff]   ;;  %v5975_v8 = vld [vmem:[#allocation2 + $0xfcc] ss:$16 sps:$4 sm:$0xff]  }
 0x229   :  { %3992 = vmatprep.subr.bf16.mxu0 %v5882_v9  ;;  %4504 = vmatprep.subr.bf16.mxu1 %v5885_v10  ;;  %v5974_v9 = vld [vmem:[#allocation2 + $0xfc0] ss:$16 sps:$4 sm:$0xff]   ;;  %v5977_v10 = vld [vmem:[#allocation2 + $0xfc8] ss:$16 sps:$4 sm:$0xff]  }
 0x22c   :  { %3994 = vmatpush1.bf16.msra.mxu0 %v5884_v11  ;;  %4506 = vmatpush1.bf16.msra.mxu1 %v5887_v12  ;;  %v5978_v11 = vld [vmem:[#allocation2 + $0xfe4] ss:$16 sps:$4 sm:$0xff]   ;;  %v5981_v12 = vld [vmem:[#allocation2 + $0xfec] ss:$16 sps:$4 sm:$0xff]  }
 0x22d   :  { %3996 = vmatprep.subr.bf16.mxu0 %v5888_v13  ;;  %4508 = vmatprep.subr.bf16.mxu1 %v5891_v14  ;;  %v5980_v13 = vld [vmem:[#allocation2 + $0xfe0] ss:$16 sps:$4 sm:$0xff]   ;;  %v5983_v14 = vld [vmem:[#allocation2 + $0xfe8] ss:$16 sps:$4 sm:$0xff]  }
 0x22f   :  { %2172 = vmatmul.mubr.f32.vlgmr.msra.gmra.mrb[0].mxu0 %v119_v17  ;;  %2740 = vmatmul.mubr.f32.vlgmr.msra.gmra.mrb[0].mxu1 %v119_v17  ;;  %v121_v17 = vld [vmem:[%s6316_s0 + $0x70] sm:$0xff] }
 0x230   :  { %3998 = vmatpush1.bf16.msra.mxu0 %v5890_v15  ;;  %4510 = vmatpush1.bf16.msra.mxu1 %v5893_v16  ;;  %v3394_v15 = vld [vmem:[#allocation6 + $0x40] sm:$0xff]  }
 0x231   :  { %4000 = vmatprep.subr.bf16.mxu0 %v5894_v18  ;;  %4512 = vmatprep.subr.bf16.mxu1 %v5897_v19  ;;  %v3410_v16 = vld [vmem:[#allocation6 + $0xc0] sm:$0xff]  }
 0x232   :  { %2242 = vmatprep.mubr.f32.mxu0 %v122_v20  ;;  %2810 = vmatprep.mubr.f32.mxu1 %v122_v20  ;;  %v3228_v18 = vld [vmem:[#allocation6] sm:$0xff]   ;;  %v3395_v20 = vld [vmem:[#allocation6 + $0x48] sm:$0xff]  }
 0x233   :  { %v3402_v19 = vld [vmem:[#allocation6 + $0x80] sm:$0xff]  }
 0x234   :  { %4002 = vmatpush1.bf16.msra.mxu0 %v5896_v21  ;;  %4514 = vmatpush1.bf16.msra.mxu1 %v5899_v22  ;;  %v3411_v21 = vld [vmem:[#allocation6 + $0xc8] sm:$0xff]  }
 0x235   :  { %4004 = vmatprep.subr.bf16.mxu0 %v5900_v23  ;;  %4516 = vmatprep.subr.bf16.mxu1 %v5903_v24  ;;  %v3387_v22 = vld [vmem:[#allocation6 + $0x8] sm:$0xff]   ;;  %v3396_v24 = vld [vmem:[#allocation6 + $0x50] sm:$0xff]  }
 0x236   :  { %v3403_v23 = vld [vmem:[#allocation6 + $0x88] sm:$0xff]  }
 0x238   :  { %4006 = vmatpush1.bf16.msra.mxu0 %v5902_v25  ;;  %4518 = vmatpush1.bf16.msra.mxu1 %v5905_v26  ;;  %v3412_v25 = vld [vmem:[#allocation6 + $0xd0] sm:$0xff]  }
 0x239   :  { %4008 = vmatprep.subr.bf16.mxu0 %v5906_v27  ;;  %4520 = vmatprep.subr.bf16.mxu1 %v5909_v28  ;;  %v3388_v26 = vld [vmem:[#allocation6 + $0x10] sm:$0xff]   ;;  %v3397_v28 = vld [vmem:[#allocation6 + $0x58] sm:$0xff]  }
 0x23a   :  { %v3404_v27 = vld [vmem:[#allocation6 + $0x90] sm:$0xff]  }
 0x23c   :  { %4010 = vmatpush1.bf16.msra.mxu0 %v5908_v29  ;;  %4522 = vmatpush1.bf16.msra.mxu1 %v5911_v30  ;;  %v3413_v29 = vld [vmem:[#allocation6 + $0xd8] sm:$0xff]  }
 0x23d   :  { %4012 = vmatprep.subr.bf16.mxu0 %v5912_v31  ;;  %4524 = vmatprep.subr.bf16.mxu1 %v5915_v32  ;;  %v3389_v30 = vld [vmem:[#allocation6 + $0x18] sm:$0xff]   ;;  %v3398_v32 = vld [vmem:[#allocation6 + $0x60] sm:$0xff]  }
 0x23e   :  { %v3405_v31 = vld [vmem:[#allocation6 + $0x98] sm:$0xff]  }
 0x240   :  { %4014 = vmatpush1.bf16.msra.mxu0 %v5914_v33  ;;  %4526 = vmatpush1.bf16.msra.mxu1 %v5917_v34  ;;  %v3414_v33 = vld [vmem:[#allocation6 + $0xe0] sm:$0xff]  }
 0x241   :  { %4016 = vmatprep.subr.bf16.mxu0 %v5918_v35  ;;  %4528 = vmatprep.subr.bf16.mxu1 %v5921_v36  ;;  %v3390_v34 = vld [vmem:[#allocation6 + $0x20] sm:$0xff]   ;;  %v3399_v36 = vld [vmem:[#allocation6 + $0x68] sm:$0xff]  }
 0x242   :  { %v3406_v35 = vld [vmem:[#allocation6 + $0xa0] sm:$0xff]  }
 0x244   :  { %4018 = vmatpush1.bf16.msra.mxu0 %v5920_v37  ;;  %4530 = vmatpush1.bf16.msra.mxu1 %v5923_v38  ;;  %v3415_v37 = vld [vmem:[#allocation6 + $0xe8] sm:$0xff]  }
 0x245   :  { %4020 = vmatprep.subr.bf16.mxu0 %v5924_v39  ;;  %4532 = vmatprep.subr.bf16.mxu1 %v5927_v40  ;;  %v3391_v38 = vld [vmem:[#allocation6 + $0x28] sm:$0xff]   ;;  %v3400_v40 = vld [vmem:[#allocation6 + $0x70] sm:$0xff]  }
 0x246   :  { %v3407_v39 = vld [vmem:[#allocation6 + $0xa8] sm:$0xff]  }
 0x248   :  { %4022 = vmatpush1.bf16.msra.mxu0 %v5926_v41  ;;  %4534 = vmatpush1.bf16.msra.mxu1 %v5929_v42  ;;  %v3416_v41 = vld [vmem:[#allocation6 + $0xf0] sm:$0xff]  }
 0x249   :  { %4024 = vmatprep.subr.bf16.mxu0 %v5930_v43  ;;  %4536 = vmatprep.subr.bf16.mxu1 %v5933_v44  ;;  %v3392_v42 = vld [vmem:[#allocation6 + $0x30] sm:$0xff]   ;;  %v3401_v44 = vld [vmem:[#allocation6 + $0x78] sm:$0xff]  }
 0x24a   :  { %v3408_v43 = vld [vmem:[#allocation6 + $0xb0] sm:$0xff]  }
 0x24c   :  { %4026 = vmatpush1.bf16.msra.mxu0 %v5932_v45  ;;  %4538 = vmatpush1.bf16.msra.mxu1 %v5935_v46  ;;  %v3417_v45 = vld [vmem:[#allocation6 + $0xf8] sm:$0xff]  }
 0x24d   :  { %4028 = vmatprep.subr.bf16.mxu0 %v5936_v47  ;;  %4540 = vmatprep.subr.bf16.mxu1 %v5939_v48  ;;  %v3393_v46 = vld [vmem:[#allocation6 + $0x38] sm:$0xff]   ;;  %v6134_v48 = vmov 0.0|0.0  }
 0x24e   :  { %v3409_v47 = vld [vmem:[#allocation6 + $0xb8] sm:$0xff]  }
 0x250   :  { %4030 = vmatpush1.bf16.msra.mxu0 %v5938_v49  ;;  %4542 = vmatpush1.bf16.msra.mxu1 %v5941_v50  ;;  %v1661_v49 = vlaneseq }
 0x251   :  { %4032 = vmatprep.subr.bf16.mxu0 %v5942_v51  ;;  %4544 = vmatprep.subr.bf16.mxu1 %v5945_v52 }
 0x252   :  { %v1662_v50 = vshrl.u32 %v1661_v49, 7 }
 0x254   :  { %4034 = vmatpush1.bf16.msra.mxu0 %v5944_v53  ;;  %4546 = vmatpush1.bf16.msra.mxu1 %v5947_v54  ;;  %v1663_v51 = vsub.s32 0, %v1662_v50  ;;  %v1671_v52 = vsub.s32 2, %v1662_v50  ;;  %v1659_v53 = vld [vmem:[#allocation4] sm:$0xf]  ;;  %v1667_v54 = vsub.s32 1, %v1662_v50 }
 0x255   :  { %4036 = vmatprep.subr.bf16.mxu0 %v5948_v55  ;;  %4548 = vmatprep.subr.bf16.mxu1 %v5951_v56  ;;  %v1675_v55 = vsub.s32 3, %v1662_v50 }
 0x256   :  { %v1664_v56 = vrot.slane %v1659_v53, %v1663_v51 }
 0x258   :  { %4038 = vmatpush1.bf16.msra.mxu0 %v5950_v57  ;;  %4550 = vmatpush1.bf16.msra.mxu1 %v5953_v58  ;;  %v1672_v57 = vrot.slane %v1659_v53, %v1671_v52  ;;  %v1668_v58 = vrot.slane %v1659_v53, %v1667_v54 }
 0x259   :  { %4040 = vmatprep.subr.bf16.mxu0 %v5954_v59  ;;  %4552 = vmatprep.subr.bf16.mxu1 %v5957_v60  ;;  %v1676_v59 = vrot.slane %v1659_v53, %v1675_v55 }
 0x25c   :  { %4042 = vmatpush1.bf16.msra.mxu0 %v5956_v61  ;;  %4554 = vmatpush1.bf16.msra.mxu1 %v5959_v62 }
 0x25d   :  { %4044 = vmatprep.subr.bf16.mxu0 %v5960_v63  ;;  %4556 = vmatprep.subr.bf16.mxu1 %v5963_v0 }
 0x260   :  { %4046 = vmatpush1.bf16.msra.mxu0 %v5962_v1  ;;  %4558 = vmatpush1.bf16.msra.mxu1 %v5965_v2 }
 0x261   :  { %4048 = vmatprep.subr.bf16.mxu0 %v5966_v3  ;;  %4560 = vmatprep.subr.bf16.mxu1 %v5969_v4 }
 0x264   :  { %4050 = vmatpush1.bf16.msra.mxu0 %v5968_v5  ;;  %4562 = vmatpush1.bf16.msra.mxu1 %v5971_v6 }
 0x265   :  { %4052 = vmatprep.subr.bf16.mxu0 %v5972_v7  ;;  %4564 = vmatprep.subr.bf16.mxu1 %v5975_v8  ;;  %v3356_v8 = vld [vmem:[#allocation9] sm:$0xff]  }
 0x268   :  { %4054 = vmatpush1.bf16.msra.mxu0 %v5974_v9  ;;  %4566 = vmatpush1.bf16.msra.mxu1 %v5977_v10  ;;  %v3418_v9 = vld [vmem:[#allocation9 + $0x8] sm:$0xff]   ;;  %v3419_v10 = vld [vmem:[#allocation9 + $0x10] sm:$0xff]  }
 0x269   :  { %4056 = vmatprep.subr.bf16.mxu0 %v5978_v11  ;;  %4568 = vmatprep.subr.bf16.mxu1 %v5981_v12  ;;  %v3420_v11 = vld [vmem:[#allocation9 + $0x18] sm:$0xff]   ;;  %v3421_v12 = vld [vmem:[#allocation9 + $0x20] sm:$0xff]  }
 0x26c   :  { %4058 = vmatpush1.bf16.msra.mxu0 %v5980_v13  ;;  %4570 = vmatpush1.bf16.msra.mxu1 %v5983_v14  ;;  %v3422_v13 = vld [vmem:[#allocation9 + $0x28] sm:$0xff]   ;;  %v3423_v14 = vld [vmem:[#allocation9 + $0x30] sm:$0xff]  }
 0x26d   :  { %4572 = vmatprep.subr.bf16.mxu0 %v3394_v15  ;;  %4604 = vmatprep.subr.bf16.mxu1 %v3410_v16  ;;  %v3424_v15 = vld [vmem:[#allocation9 + $0x38] sm:$0xff]   ;;  %v6136_v16 = vmov 0.0  }
 0x26f   :  { %2243 = vmatmul.mubr.f32.vlgmr.msra.gmra.mrb[0].mxu0 %v121_v17  ;;  %2811 = vmatmul.mubr.f32.vlgmr.msra.gmra.mrb[0].mxu1 %v121_v17 }
 0x270   :  { %4574 = vmatpush3.bf16.msra.mxu0 %v3228_v18  ;;  %4606 = vmatpush3.bf16.msra.mxu1 %v3402_v19  ;;  %v3225_v19 = vld [vmem:[#allocation7] ss:$0 sm:$0xff] }
 0x271   :  { %4576 = vmatprep.subr.bf16.mxu0 %v3395_v20  ;;  %4608 = vmatprep.subr.bf16.mxu1 %v3411_v21 }
 0x274   :  { %4578 = vmatpush3.bf16.msra.mxu0 %v3387_v22  ;;  %4610 = vmatpush3.bf16.msra.mxu1 %v3403_v23 }
 0x275   :  { %4580 = vmatprep.subr.bf16.mxu0 %v3396_v24  ;;  %4612 = vmatprep.subr.bf16.mxu1 %v3412_v25 }
 0x278   :  { %4582 = vmatpush3.bf16.msra.mxu0 %v3388_v26  ;;  %4614 = vmatpush3.bf16.msra.mxu1 %v3404_v27  ;;  %v3226_v27 = vld [vmem:[#allocation10] ss:$0 sm:$0xff] }
 0x279   :  { %4584 = vmatprep.subr.bf16.mxu0 %v3397_v28  ;;  %4616 = vmatprep.subr.bf16.mxu1 %v3413_v29  ;;  %v3207_v29 = vld [vmem:[%s6317_s1] sm:$0xff] }
 0x27c   :  { %4586 = vmatpush3.bf16.msra.mxu0 %v3389_v30  ;;  %4618 = vmatpush3.bf16.msra.mxu1 %v3405_v31 }
 0x27d   :  { %4588 = vmatprep.subr.bf16.mxu0 %v3398_v32  ;;  %4620 = vmatprep.subr.bf16.mxu1 %v3414_v33 }
 0x280   :  { %4590 = vmatpush3.bf16.msra.mxu0 %v3390_v34  ;;  %4622 = vmatpush3.bf16.msra.mxu1 %v3406_v35 }
 0x281   :  { %4592 = vmatprep.subr.bf16.mxu0 %v3399_v36  ;;  %4624 = vmatprep.subr.bf16.mxu1 %v3415_v37 }
 0x284   :  { %4594 = vmatpush3.bf16.msra.mxu0 %v3391_v38  ;;  %4626 = vmatpush3.bf16.msra.mxu1 %v3407_v39 }
 0x285   :  { %4596 = vmatprep.subr.bf16.mxu0 %v3400_v40  ;;  %4628 = vmatprep.subr.bf16.mxu1 %v3416_v41 }
 0x288   :  { %4598 = vmatpush3.bf16.msra.mxu0 %v3392_v42  ;;  %4630 = vmatpush3.bf16.msra.mxu1 %v3408_v43 }
 0x289   :  { %4600 = vmatprep.subr.bf16.mxu0 %v3401_v44  ;;  %4632 = vmatprep.subr.bf16.mxu1 %v3417_v45 }
 0x28c   :  { %4602 = vmatpush3.bf16.msra.mxu0 %v3393_v46  ;;  %4634 = vmatpush3.bf16.msra.mxu1 %v3409_v47 }
 0x28d   :  { %4635 = vmatprep.subr.bf16.mxu0 %v6134_v48 }
 0x342   :  { %v2244_v60 = vpop.f32.mrb[0].mxu0  ;;  %v2812_v61 = vpop.f32.mrb[0].mxu1 }
 0x343   :  { %v4659_v62 = vadd.f32 %v2244_v60, %v1664_v56  ;;  %v4661_v63 = vadd.f32 %v2812_v61, %v1672_v57  ;;  %v2246_v0 = vpop.f32.mrb[1].mxu0  ;;  %v2814_v1 = vpop.f32.mrb[1].mxu1 }
 0x344   :  { %v4660_v2 = vadd.f32 %v2246_v0, %v1668_v58  ;;  %v4662_v3 = vadd.f32 %v2814_v1, %v1676_v59 }
 0x345   :  { %v2817_v6 = vmax.f32 %v4659_v62, 0.0  ;;  %v2819_v7 = vmax.f32 %v4661_v63, 0.0 }
 0x346   :  { %v2818_v4 = vmax.f32 %v4660_v2, 0.0  ;;  %v2820_v5 = vmax.f32 %v4662_v3, 0.0 }
 0x348   :  { %3020 = vmatprep.mubr.f32.mxu0 %v2818_v4  ;;  %3090 = vmatprep.mubr.f32.mxu1 %v2820_v5 }
 0x349   :  { %3021 = vmatmul.mubr.f32.vlgmr.msra.gmra.mrb[2].mxu0 %v2817_v6  ;;  %3091 = vmatmul.mubr.f32.vlgmr.msra.gmra.mrb[2].mxu1 %v2819_v7 }
 0x34a   :  { %4637 = vmatpush3.bf16.msra.mxu0 %v3356_v8  ;;  %3544 = vmatprep.mubr.msk.f32.mxu0 %vm6135_vm0, %v6136_v16 }
 0x34b   :  { %4638 = vmatprep.subr.bf16.mxu0 %v6134_v48 }
 0x34e   :  { %4640 = vmatpush3.bf16.msra.mxu0 %v3418_v9 }
 0x34f   :  { %4641 = vmatprep.subr.bf16.mxu0 %v6134_v48 }
 0x352   :  { %4643 = vmatpush3.bf16.msra.mxu0 %v3419_v10 }
 0x353   :  { %4644 = vmatprep.subr.bf16.mxu0 %v6134_v48 }
 0x356   :  { %4646 = vmatpush3.bf16.msra.mxu0 %v3420_v11 }
 0x357   :  { %4647 = vmatprep.subr.bf16.mxu0 %v6134_v48 }
 0x35a   :  { %4649 = vmatpush3.bf16.msra.mxu0 %v3421_v12 }
 0x35b   :  { %4650 = vmatprep.subr.bf16.mxu0 %v6134_v48 }
 0x35e   :  { %4652 = vmatpush3.bf16.msra.mxu0 %v3422_v13 }
 0x35f   :  { %4653 = vmatprep.subr.bf16.mxu0 %v6134_v48 }
 0x362   :  { %4655 = vmatpush3.bf16.msra.mxu0 %v3423_v14 }
 0x363   :  { %4656 = vmatprep.subr.bf16.mxu0 %v6134_v48 }
 0x366   :  { %4658 = vmatpush3.bf16.msra.mxu0 %v3424_v15 }
 0x41c   :  { %v3457_v17 = vpop.f32.mrb[2].mxu0  ;;  %v3492_v18 = vpop.f32.mrb[2].mxu1 }
 0x41d   :  { %v3458_v20 = vpop.f32.mrb[3].mxu0  ;;  %v3493_v21 = vpop.f32.mrb[3].mxu1 }
 0x41e   :  { %v3459_v22 = vadd.f32 %v3458_v20, %v3457_v17  ;;  %v3494_v23 = vadd.f32 %v3493_v21, %v3492_v18 }
 0x420   :  { %v3023_v24 = vadd.f32 %v3459_v22, %v3225_v19 }
 0x422   :  { %v3093_v25 = vadd.f32 %v3494_v23, %v3023_v24 }
 0x424   :  { %v3096_v26 = vmax.f32 %v3093_v25, 0.0 }
 0x426   :  { %3545 = vmatmul.mubr.f32.vlgmr.msra.gmra.mrb[4].mxu0 %v3096_v26 }
 0x4f9   :  { %v3202_v28 = vpop.f32.mrb[4].mxu0 }
 0x4fa   :  { %v3203_v30 = vadd.f32 %v3226_v27, %v3202_v28  ;;  %v3546_v31 = vpop.f32.mrb[5].mxu0 }
 0x4fc   :  { %3206 = vst [vmem:[%s6324_s8] sm:$0xff] %v3203_v30  ;;  %v3208_v32 = vmul.f32 %v3207_v29, %v3203_v30 }
 0x4fe   :  { %3209 = vadd.xlane.f32.xlu0 %v3208_v32 }
 0x58b   :  { %v3210_v33 = vpop.xlane.xlu0 %3209 }
 0x58c   :  { %3212 = vst.msk [vmem:[%s6325_s9] sm:$0xff] %vm3211_vm1, %v3210_v33 }
 0x58d   :  { %3221 = vsyncpa [#allocation3], 1 }
 0x58e   :  { %3222 = vsyncpa [#allocation5], 1 }
 0x58f   :  { %3223 = vsyncpa [#allocation8], 1 }
 0x590   :  { %3224 = vsyncpa [#allocation11], 1 }

</bundles_post_ra>
